<compile_context>
chip_gen: v7x
topology: tpu7x:2x2x1
jax: 0.10.0
libtpu: 0.0.40
codegen_flags: <defaults>
</compile_context>

<pallas_src>
import jax
import jax.numpy as jnp
from jax.experimental import pallas as pl
from jax.experimental.pallas import tpu as pltpu


# ----------------------------------------------------------------------------
# small helpers
# ----------------------------------------------------------------------------
def _round_up(x, m):
    return ((x + m - 1) // m) * m


def _l_after_convs(seq_len):
    l = seq_len
    for _ in range(3):          # three pools of kernel_size=2 (floor semantics)
        l = l // 2
    return l


# ----------------------------------------------------------------------------
# fused conv stack kernel: conv1/bn1/avgpool/relu -> conv2/maxpool/relu/bn2
#                          -> conv3/maxpool/bn3/relu     (dropouts = identity)
# layout inside the kernel: (L, C) channel-last (sequence on sublanes,
# channels on lanes; final block is lane-dense with C=128).
# ----------------------------------------------------------------------------
def _conv1d_same(x, w_mat):
    """'same' Conv1d as ONE folded matmul (taps stacked along lanes).

    x: (L, Cin) f32, w_mat: (K*Cin, Cout) f32 (rows ordered tap-major,
    channel-minor) -> (L, Cout) f32.
    """
    L, Cin = x.shape
    K = w_mat.shape[0] // Cin
    pad = K // 2
    zpad = jnp.zeros((pad, Cin), x.dtype)
    xp = jnp.concatenate([zpad, x, zpad], axis=0)                 # (L+2p, Cin)
    cols = jnp.concatenate([xp[k:k + L, :] for k in range(K)], axis=1)  # (L, K*Cin)
    return jnp.dot(cols, w_mat, preferred_element_type=jnp.float32)


def _pool2(y, mode):
    """kernel_size=2, stride=2 pooling along the sequence (sublane) axis.

    Floor-drops a trailing odd row, matching torch.nn.{Avg,Max}Pool1d.
    """
    L, C = y.shape
    Lout = L // 2
    y = y[:2 * Lout, :].reshape(Lout, 2, C)
    return jnp.mean(y, axis=1) if mode == "avg" else jnp.max(y, axis=1)


def _conv_stack_kernel(x_ref,
                       w1_ref, s1_ref, t1_ref,
                       w2_ref, b2_ref, s2_ref, t2_ref,
                       w3_ref, s3_ref, t3_ref,
                       o_ref):
    x = x_ref[0]                                          # (L, Cin) float32
    # --- block 1: conv1 -> bn1 (conv bias folded into shift) -> AvgPool -> ReLU
    y = _conv1d_same(x, w1_ref[...]) * s1_ref[...] + t1_ref[...]
    y = _pool2(y, "avg")
    y = jnp.maximum(y, 0.0)
    # --- block 2: conv2 -> MaxPool -> (+bias, moved past the max: exact) -> ReLU -> bn2
    y = _conv1d_same(y, w2_ref[...])
    y = _pool2(y, "max") + b2_ref[...]
    y = jnp.maximum(y, 0.0)
    y = y * s2_ref[...] + t2_ref[...]
    # --- block 3: conv3 -> MaxPool -> bn3 (conv bias folded into shift) -> ReLU
    y = _conv1d_same(y, w3_ref[...])
    y = _pool2(y, "max") * s3_ref[...] + t3_ref[...]
    y = jnp.maximum(y, 0.0)
    o_ref[0] = y.astype(o_ref.dtype)                      # (L3, 128) lane-dense


def _const_spec(shape):
    ndim = len(shape)
    return pl.BlockSpec(shape, lambda n, _nd=ndim: (0,) * _nd)


def _conv_stack(x_cl, kp):
    """x_cl: (N, L, Cin) channel-last -> (N, L3, 128) float32 (fused, one call).

    Per-sample activations stay entirely in VMEM; only the input and the final
    (small) block-3 output touch HBM.
    """
    N, L, Cin = x_cl.shape
    L3 = _l_after_convs(L)
    consts = [kp["w1m"], kp["cs1"], kp["ct1"],
              kp["w2m"], kp["cb2"], kp["cs2"], kp["ct2"],
              kp["w3m"], kp["cs3"], kp["ct3"]]
    in_specs = [pl.BlockSpec((1, L, Cin), lambda n: (n, 0, 0))]
    in_specs += [_const_spec(c.shape) for c in consts]
    return pl.pallas_call(
        _conv_stack_kernel,
        out_shape=jax.ShapeDtypeStruct((N, L3, 128), jnp.float32),
        grid=(N,),
        in_specs=in_specs,
        out_specs=pl.BlockSpec((1, L3, 128), lambda n: (n, 0, 0)),
        compiler_params=pltpu.CompilerParams(
            dimension_semantics=("parallel",),
            vmem_limit_bytes=32 * 1024 * 1024),
    )(x_cl, *consts)


# ----------------------------------------------------------------------------
# tiled dense matmul:  y = x @ w + b  (bf16 weight stream, f32 accumulation)
# ----------------------------------------------------------------------------
_TK_DENSE = 512   # contraction-tile (rows of w) per grid step
_TN_DENSE = 256   # output-feature tile per grid step (multiple of 128)


def _dense_matmul_kernel(x_ref, w_ref, b_ref, o_ref, acc_ref):
    k = pl.program_id(1)

    @pl.when(k == 0)
    def _():
        acc_ref[...] = jnp.zeros_like(acc_ref)

    acc_ref[...] += jnp.dot(x_ref[...].astype(jnp.bfloat16), w_ref[...],
                            preferred_element_type=jnp.float32)

    @pl.when(k == pl.num_programs(1) - 1)
    def _():
        o_ref[...] = (acc_ref[...] + b_ref[...]).astype(o_ref.dtype)


def _dense_matmul(x, w, b, *, tk=_TK_DENSE, tn=_TN_DENSE):
    """x: (M, K) f32, w: (K, Nd) bf16, b: (1, Nd) f32 -> (M, Nd) f32.

    Grid = (out-feature tiles, contraction tiles); the f32 accumulator lives in
    VMEM scratch and the output tile is written once on the last k step, so the
    (potentially huge) weight matrix only ever occupies one (tk, tn) tile in
    VMEM at a time.  Output tiles are lane-dense (Nd padded to a 128-multiple).
    K/Nd padding at these shapes is a no-op or tiny (one-time weight prep in
    production); batch M is tiny and kept as a full block.
    """
    M, K = x.shape
    Kw, Nd = w.shape
    assert K == Kw
    tk = min(tk, _round_up(K, 8))
    tn = min(tn, _round_up(Nd, 128))
    Kp = _round_up(K, tk)
    Np = _round_up(Nd, tn)
    if Kp != K:
        x = jnp.pad(x, ((0, 0), (0, Kp - K)))
        w = jnp.pad(w, ((0, Kp - K), (0, 0)))
    if Np != Nd:
        w = jnp.pad(w, ((0, 0), (0, Np - Nd)))
        b = jnp.pad(b, ((0, 0), (0, Np - Nd)))

    out = pl.pallas_call(
        _dense_matmul_kernel,
        out_shape=jax.ShapeDtypeStruct((M, Np), jnp.float32),
        grid=(Np // tn, Kp // tk),
        in_specs=[
            pl.BlockSpec((M, tk), lambda j, k: (0, k)),
            pl.BlockSpec((tk, tn), lambda j, k: (k, j)),
            pl.BlockSpec((1, tn), lambda j, k: (0, j)),
        ],
        out_specs=pl.BlockSpec((M, tn), lambda j, k: (0, j)),
        scratch_shapes=[pltpu.VMEM((M, tn), jnp.float32)],
        compiler_params=pltpu.CompilerParams(
            dimension_semantics=("parallel", "arbitrary"),
            vmem_limit_bytes=32 * 1024 * 1024),
    )(x, w, b)
    return out[:, :Nd] if Np != Nd else out


# ----------------------------------------------------------------------------
# full forward
# ----------------------------------------------------------------------------
def cnn_network_seq_forward(x_ncl, kparams):
    """x_ncl: (N, Cin, L) — PyTorch Conv1d layout.  Returns (N, 14, L_FC)."""
    N = x_ncl.shape[0]
    # Single transpose of the (tiny) raw input to channel-last; all larger
    # activations stay in kernel-friendly layouts end-to-end.
    x = jnp.transpose(x_ncl, (0, 2, 1))                   # (N, L, Cin)
    y = _conv_stack(x, kparams)                           # (N, L3, 128)
    y = y.reshape(N, -1)                                  # l-major flatten
    h = _dense_matmul(y, kparams["wl1"], kparams["bl1"])  # linear1 -> (N, 256)
    out = _dense_matmul(h, kparams["wfc"], kparams["bfc"])  # fc -> (N, 14*L_FC)
    return out.reshape(N, 14, -1)


def prepare_kernel_params(params, l3):
    """One-time weight prep (outside jit).  Pure relabeling / exact folds —
    same math as the module in eval mode."""
    kp = {}
    # conv taps folded into (K*Cin, Cout) matmul form (tap-major rows).
    for i in (1, 2, 3):
        w = params[f"w{i}"]                               # (K, Cin, Cout)
        K, Cin, Cout = w.shape
        kp[f"w{i}m"] = w.reshape(K * Cin, Cout)
    # block 1: bn directly follows conv -> fold conv bias into bn shift (exact).
    kp["cs1"] = params["bn1_scale"]
    kp["ct1"] = params["b1"] * params["bn1_scale"] + params["bn1_shift"]
    # block 2: bias applied after the max-pool (exact for per-channel const).
    kp["cb2"] = params["b2"]
    kp["cs2"] = params["bn2_scale"]
    kp["ct2"] = params["bn2_shift"]
    # block 3: bias commutes with max-pool, then folds into bn shift (exact).
    kp["cs3"] = params["bn3_scale"]
    kp["ct3"] = params["b3"] * params["bn3_scale"] + params["bn3_shift"]
    # dense: permute linear1 rows once so the kernel's l-major flatten equals
    # PyTorch's channel-major view(N, -1); stream dense weights as bf16.
    wl1 = params["wl1"]                                   # rows ordered c*L3 + l
    wl1 = wl1.reshape(128, l3, -1).transpose(1, 0, 2).reshape(128 * l3, -1)
    kp["wl1"] = wl1.astype(jnp.bfloat16)
    kp["bl1"] = params["bl1"]
    kp["wfc"] = params["wfc"].astype(jnp.bfloat16)
    kp["bfc"] = params["bfc"]
    return kp


# ----------------------------------------------------------------------------
# deterministic parameter construction (synthetic — no checkpoint load)
# ----------------------------------------------------------------------------
def init_params(key, c_in, seq_len, l_fc):
    keys = jax.random.split(key, 24)
    ki = iter(range(24))

    def nxt():
        return keys[next(ki)]

    def bn_params(c):
        gamma = 1.0 + 0.1 * jax.random.normal(nxt(), (1, c))
        beta = 0.1 * jax.random.normal(nxt(), (1, c))
        mean = 0.1 * jax.random.normal(nxt(), (1, c))
        var = 1.0 + 0.1 * jnp.abs(jax.random.normal(nxt(), (1, c)))
        scale = gamma / jnp.sqrt(var + 1e-5)
        shift = beta - mean * scale
        return scale.astype(jnp.float32), shift.astype(jnp.float32)

    p = {}
    # conv weights stored as (K, Cin, Cout) (torch Conv1d weight is (Cout, Cin, K))
    p["w1"] = 0.05 * jax.random.normal(nxt(), (3, c_in, 32), jnp.float32)
    p["b1"] = 0.05 * jax.random.normal(nxt(), (1, 32), jnp.float32)
    p["bn1_scale"], p["bn1_shift"] = bn_params(32)

    p["w2"] = 0.05 * jax.random.normal(nxt(), (5, 32, 64), jnp.float32)
    p["b2"] = 0.05 * jax.random.normal(nxt(), (1, 64), jnp.float32)
    p["bn2_scale"], p["bn2_shift"] = bn_params(64)

    p["w3"] = 0.05 * jax.random.normal(nxt(), (3, 64, 128), jnp.float32)
    p["b3"] = 0.05 * jax.random.normal(nxt(), (1, 128), jnp.float32)
    p["bn3_scale"], p["bn3_shift"] = bn_params(128)

    flat = 128 * _l_after_convs(seq_len)                  # 128 channels * L/8
    # linear weights pre-transposed to (in_features, out_features);
    # wl1 rows are in PyTorch channel-major flatten order (as a checkpoint would be).
    p["wl1"] = 0.02 * jax.random.normal(nxt(), (flat, 256), jnp.float32)
    p["bl1"] = 0.02 * jax.random.normal(nxt(), (1, 256), jnp.float32)
    p["wfc"] = 0.02 * jax.random.normal(nxt(), (256, 14 * l_fc), jnp.float32)
    p["bfc"] = 0.02 * jax.random.normal(nxt(), (1, 14 * l_fc), jnp.float32)
    return p


# ----------------------------------------------------------------------------
# pure-JAX reference (PyTorch op order / layouts; dense weights cast to bf16 to
# mirror the kernel's quantization choice, f32 accumulation)
# ----------------------------------------------------------------------------
def reference_forward(x_ncl, params):
    x = jnp.transpose(x_ncl, (0, 2, 1))                   # (N, L, Cin)

    def conv_same(x, w, b):
        K = w.shape[0]
        pad = K // 2
        L = x.shape[1]
        xp = jnp.pad(x, ((0, 0), (pad, pad), (0, 0)))
        out = sum(jnp.einsum("nlc,cd->nld", xp[:, k:k + L, :], w[k])
                  for k in range(K))
        return out + b

    def pool(x, mode):
        N, L, C = x.shape
        Lo = L // 2
        xr = x[:, :2 * Lo].reshape(N, Lo, 2, C)
        return xr.mean(axis=2) if mode == "avg" else xr.max(axis=2)

    # block 1
    x = conv_same(x, params["w1"], params["b1"])
    x = x * params["bn1_scale"] + params["bn1_shift"]
    x = pool(x, "avg")
    x = jnp.maximum(x, 0.0)
    # block 2
    x = conv_same(x, params["w2"], params["b2"])
    x = pool(x, "max")
    x = jnp.maximum(x, 0.0)
    x = x * params["bn2_scale"] + params["bn2_shift"]
    # block 3
    x = conv_same(x, params["w3"], params["b3"])
    x = pool(x, "max")
    x = x * params["bn3_scale"] + params["bn3_shift"]
    x = jnp.maximum(x, 0.0)
    # dense — PyTorch channel-major flatten
    N = x.shape[0]
    x = jnp.transpose(x, (0, 2, 1)).reshape(N, -1)
    x = jnp.dot(x.astype(jnp.bfloat16), params["wl1"].astype(jnp.bfloat16),
                preferred_element_type=jnp.float32) + params["bl1"]
    x = jnp.dot(x.astype(jnp.bfloat16), params["wfc"].astype(jnp.bfloat16),
                preferred_element_type=jnp.float32) + params["bfc"]
    return x.reshape(N, 14, -1)


# ----------------------------------------------------------------------------
if __name__ == "__main__":
    N, C_IN, SEQ, L_FC = 2, 12, 64, 16   # small shapes (original: Cin=12, L=12246)

    key = jax.random.PRNGKey(0)
    k_x, k_p = jax.random.split(key)
    x = jax.random.normal(k_x, (N, C_IN, SEQ), jnp.float32)   # (N, C, L) as in PyTorch
    params = init_params(k_p, C_IN, SEQ, L_FC)
    kparams = prepare_kernel_params(params, _l_after_convs(SEQ))

    fwd = jax.jit(cnn_network_seq_forward)
    out = jax.block_until_ready(fwd(x, kparams))

    assert out.shape == (N, 14, L_FC), out.shape

    ref = reference_forward(x, params)
    err = float(jnp.max(jnp.abs(out - ref)))
    assert err < 5e-2, f"kernel/reference mismatch, max abs err = {err}"

    print("KERNEL_OK")
</pallas_src>

<mosaic_0001>
module attributes {stable_mosaic.version = 11 : i64} {
  func.func @_conv_stack_kernel(%arg0: i32, %arg1: memref<1x64x12xf32, #tpu.memory_space<vmem>>, %arg2: memref<36x32xf32, #tpu.memory_space<vmem>>, %arg3: memref<1x32xf32, #tpu.memory_space<vmem>>, %arg4: memref<1x32xf32, #tpu.memory_space<vmem>>, %arg5: memref<160x64xf32, #tpu.memory_space<vmem>>, %arg6: memref<1x64xf32, #tpu.memory_space<vmem>>, %arg7: memref<1x64xf32, #tpu.memory_space<vmem>>, %arg8: memref<1x64xf32, #tpu.memory_space<vmem>>, %arg9: memref<192x128xf32, #tpu.memory_space<vmem>>, %arg10: memref<1x128xf32, #tpu.memory_space<vmem>>, %arg11: memref<1x128xf32, #tpu.memory_space<vmem>>, %arg12: memref<1x8x128xf32, #tpu.memory_space<vmem>>) attributes {dimension_semantics = [#tpu.dimension_semantics<parallel>], iteration_bounds = array<i64: 2>, scalar_prefetch = 0 : i64, scratch_operands = 0 : i64, tpu.core_type = #tpu.core_type<tc>, window_params = [{transform_indices = @transform_0, window_bounds = array<i64: 1, 64, 12>}, {pipeline_mode = #tpu.pipeline_mode<synchronous>, transform_indices = @transform_1, window_bounds = array<i64: 36, 32>}, {pipeline_mode = #tpu.pipeline_mode<synchronous>, transform_indices = @transform_2, window_bounds = array<i64: 1, 32>}, {pipeline_mode = #tpu.pipeline_mode<synchronous>, transform_indices = @transform_3, window_bounds = array<i64: 1, 32>}, {pipeline_mode = #tpu.pipeline_mode<synchronous>, transform_indices = @transform_4, window_bounds = array<i64: 160, 64>}, {pipeline_mode = #tpu.pipeline_mode<synchronous>, transform_indices = @transform_5, window_bounds = array<i64: 1, 64>}, {pipeline_mode = #tpu.pipeline_mode<synchronous>, transform_indices = @transform_6, window_bounds = array<i64: 1, 64>}, {pipeline_mode = #tpu.pipeline_mode<synchronous>, transform_indices = @transform_7, window_bounds = array<i64: 1, 64>}, {pipeline_mode = #tpu.pipeline_mode<synchronous>, transform_indices = @transform_8, window_bounds = array<i64: 192, 128>}, {pipeline_mode = #tpu.pipeline_mode<synchronous>, transform_indices = @transform_9, window_bounds = array<i64: 1, 128>}, {pipeline_mode = #tpu.pipeline_mode<synchronous>, transform_indices = @transform_10, window_bounds = array<i64: 1, 128>}, {transform_indices = @transform_11, window_bounds = array<i64: 1, 8, 128>}]} {
    %c0 = arith.constant 0 : index
    %c0_0 = arith.constant 0 : index
    %c0_1 = arith.constant 0 : index
    %0 = vector.load %arg1[%c0, %c0_0, %c0_1] : memref<1x64x12xf32, #tpu.memory_space<vmem>>, vector<1x64x12xf32>
    %1 = vector.shape_cast %0 : vector<1x64x12xf32> to vector<64x12xf32>
    %c0_2 = arith.constant 0 : index
    %c0_3 = arith.constant 0 : index
    %2 = vector.load %arg2[%c0_2, %c0_3] : memref<36x32xf32, #tpu.memory_space<vmem>>, vector<36x32xf32>
    %cst = arith.constant 0.000000e+00 : f32
    %3 = vector.broadcast %cst : f32 to vector<1x12xf32>
    %4 = tpu.concatenate %3, %1, %3 in 0 : vector<1x12xf32>, vector<64x12xf32>, vector<1x12xf32> -> vector<66x12xf32>
    %5 = vector.extract_strided_slice %4 {offsets = [0, 0], sizes = [64, 12], strides = [1, 1]} : vector<66x12xf32> to vector<64x12xf32>
    %6 = vector.extract_strided_slice %4 {offsets = [1, 0], sizes = [64, 12], strides = [1, 1]} : vector<66x12xf32> to vector<64x12xf32>
    %7 = vector.extract_strided_slice %4 {offsets = [2, 0], sizes = [64, 12], strides = [1, 1]} : vector<66x12xf32> to vector<64x12xf32>
    %8 = tpu.concatenate %5, %6, %7 in 1 : vector<64x12xf32>, vector<64x12xf32>, vector<64x12xf32> -> vector<64x36xf32>
    %cst_4 = arith.constant dense<0.000000e+00> : vector<64x32xf32>
    %9 = tpu.matmul %8, %2, %cst_4 {dimension_numbers = #tpu.dot_dimension_numbers<[1], [0], [0], [1], [0, 0, 1, 1], [], []>} : vector<64x36xf32>, vector<36x32xf32>, vector<64x32xf32> -> vector<64x32xf32>
    %c0_5 = arith.constant 0 : index
    %c0_6 = arith.constant 0 : index
    %10 = vector.load %arg3[%c0_5, %c0_6] : memref<1x32xf32, #tpu.memory_space<vmem>>, vector<1x32xf32>
    %11 = vector.broadcast %10 : vector<1x32xf32> to vector<64x32xf32>
    %12 = arith.mulf %9, %11 : vector<64x32xf32>
    %c0_7 = arith.constant 0 : index
    %c0_8 = arith.constant 0 : index
    %13 = vector.load %arg4[%c0_7, %c0_8] : memref<1x32xf32, #tpu.memory_space<vmem>>, vector<1x32xf32>
    %14 = vector.broadcast %13 : vector<1x32xf32> to vector<64x32xf32>
    %15 = arith.addf %12, %14 : vector<64x32xf32>
    %16 = vector.shape_cast %15 : vector<64x32xf32> to vector<32x2x32xf32>
    %cst_9 = arith.constant dense<0.000000e+00> : vector<32x32xf32>
    %17 = vector.multi_reduction <add>, %16, %cst_9 [1] : vector<32x2x32xf32> to vector<32x32xf32>
    %cst_10 = arith.constant 2.000000e+00 : f32
    %18 = vector.broadcast %cst_10 : f32 to vector<32x32xf32>
    %19 = arith.divf %17, %18 : vector<32x32xf32>
    %cst_11 = arith.constant 0.000000e+00 : f32
    %20 = vector.broadcast %cst_11 : f32 to vector<32x32xf32>
    %21 = arith.maximumf %19, %20 : vector<32x32xf32>
    %c0_12 = arith.constant 0 : index
    %c0_13 = arith.constant 0 : index
    %22 = vector.load %arg5[%c0_12, %c0_13] : memref<160x64xf32, #tpu.memory_space<vmem>>, vector<160x64xf32>
    %cst_14 = arith.constant 0.000000e+00 : f32
    %23 = vector.broadcast %cst_14 : f32 to vector<2x32xf32>
    %24 = tpu.concatenate %23, %21, %23 in 0 : vector<2x32xf32>, vector<32x32xf32>, vector<2x32xf32> -> vector<36x32xf32>
    %25 = vector.extract_strided_slice %24 {offsets = [0, 0], sizes = [32, 32], strides = [1, 1]} : vector<36x32xf32> to vector<32x32xf32>
    %26 = vector.extract_strided_slice %24 {offsets = [1, 0], sizes = [32, 32], strides = [1, 1]} : vector<36x32xf32> to vector<32x32xf32>
    %27 = vector.extract_strided_slice %24 {offsets = [2, 0], sizes = [32, 32], strides = [1, 1]} : vector<36x32xf32> to vector<32x32xf32>
    %28 = vector.extract_strided_slice %24 {offsets = [3, 0], sizes = [32, 32], strides = [1, 1]} : vector<36x32xf32> to vector<32x32xf32>
    %29 = vector.extract_strided_slice %24 {offsets = [4, 0], sizes = [32, 32], strides = [1, 1]} : vector<36x32xf32> to vector<32x32xf32>
    %30 = tpu.concatenate %25, %26, %27, %28, %29 in 1 : vector<32x32xf32>, vector<32x32xf32>, vector<32x32xf32>, vector<32x32xf32>, vector<32x32xf32> -> vector<32x160xf32>
    %cst_15 = arith.constant dense<0.000000e+00> : vector<32x64xf32>
    %31 = tpu.matmul %30, %22, %cst_15 {dimension_numbers = #tpu.dot_dimension_numbers<[1], [0], [0], [1], [0, 0, 1, 1], [], []>} : vector<32x160xf32>, vector<160x64xf32>, vector<32x64xf32> -> vector<32x64xf32>
    %32 = vector.shape_cast %31 : vector<32x64xf32> to vector<16x2x64xf32>
    %cst_16 = arith.constant dense<0xFF800000> : vector<16x64xf32>
    %33 = vector.multi_reduction <maximumf>, %32, %cst_16 [1] : vector<16x2x64xf32> to vector<16x64xf32>
    %c0_17 = arith.constant 0 : index
    %c0_18 = arith.constant 0 : index
    %34 = vector.load %arg6[%c0_17, %c0_18] : memref<1x64xf32, #tpu.memory_space<vmem>>, vector<1x64xf32>
    %35 = vector.broadcast %34 : vector<1x64xf32> to vector<16x64xf32>
    %36 = arith.addf %33, %35 : vector<16x64xf32>
    %cst_19 = arith.constant 0.000000e+00 : f32
    %37 = vector.broadcast %cst_19 : f32 to vector<16x64xf32>
    %38 = arith.maximumf %36, %37 : vector<16x64xf32>
    %c0_20 = arith.constant 0 : index
    %c0_21 = arith.constant 0 : index
    %39 = vector.load %arg7[%c0_20, %c0_21] : memref<1x64xf32, #tpu.memory_space<vmem>>, vector<1x64xf32>
    %40 = vector.broadcast %39 : vector<1x64xf32> to vector<16x64xf32>
    %41 = arith.mulf %38, %40 : vector<16x64xf32>
    %c0_22 = arith.constant 0 : index
    %c0_23 = arith.constant 0 : index
    %42 = vector.load %arg8[%c0_22, %c0_23] : memref<1x64xf32, #tpu.memory_space<vmem>>, vector<1x64xf32>
    %43 = vector.broadcast %42 : vector<1x64xf32> to vector<16x64xf32>
    %44 = arith.addf %41, %43 : vector<16x64xf32>
    %c0_24 = arith.constant 0 : index
    %c0_25 = arith.constant 0 : index
    %45 = vector.load %arg9[%c0_24, %c0_25] : memref<192x128xf32, #tpu.memory_space<vmem>>, vector<192x128xf32>
    %cst_26 = arith.constant 0.000000e+00 : f32
    %46 = vector.broadcast %cst_26 : f32 to vector<1x64xf32>
    %47 = tpu.concatenate %46, %44, %46 in 0 : vector<1x64xf32>, vector<16x64xf32>, vector<1x64xf32> -> vector<18x64xf32>
    %48 = vector.extract_strided_slice %47 {offsets = [0, 0], sizes = [16, 64], strides = [1, 1]} : vector<18x64xf32> to vector<16x64xf32>
    %49 = vector.extract_strided_slice %47 {offsets = [1, 0], sizes = [16, 64], strides = [1, 1]} : vector<18x64xf32> to vector<16x64xf32>
    %50 = vector.extract_strided_slice %47 {offsets = [2, 0], sizes = [16, 64], strides = [1, 1]} : vector<18x64xf32> to vector<16x64xf32>
    %51 = tpu.concatenate %48, %49, %50 in 1 : vector<16x64xf32>, vector<16x64xf32>, vector<16x64xf32> -> vector<16x192xf32>
    %cst_27 = arith.constant dense<0.000000e+00> : vector<16x128xf32>
    %52 = tpu.matmul %51, %45, %cst_27 {dimension_numbers = #tpu.dot_dimension_numbers<[1], [0], [0], [1], [0, 0, 1, 1], [], []>} : vector<16x192xf32>, vector<192x128xf32>, vector<16x128xf32> -> vector<16x128xf32>
    %53 = vector.shape_cast %52 : vector<16x128xf32> to vector<8x2x128xf32>
    %cst_28 = arith.constant dense<0xFF800000> : vector<8x128xf32>
    %54 = vector.multi_reduction <maximumf>, %53, %cst_28 [1] : vector<8x2x128xf32> to vector<8x128xf32>
    %c0_29 = arith.constant 0 : index
    %c0_30 = arith.constant 0 : index
    %55 = vector.load %arg10[%c0_29, %c0_30] : memref<1x128xf32, #tpu.memory_space<vmem>>, vector<1x128xf32>
    %56 = vector.broadcast %55 : vector<1x128xf32> to vector<8x128xf32>
    %57 = arith.mulf %54, %56 : vector<8x128xf32>
    %c0_31 = arith.constant 0 : index
    %c0_32 = arith.constant 0 : index
    %58 = vector.load %arg11[%c0_31, %c0_32] : memref<1x128xf32, #tpu.memory_space<vmem>>, vector<1x128xf32>
    %59 = vector.broadcast %58 : vector<1x128xf32> to vector<8x128xf32>
    %60 = arith.addf %57, %59 : vector<8x128xf32>
    %cst_33 = arith.constant 0.000000e+00 : f32
    %61 = vector.broadcast %cst_33 : f32 to vector<8x128xf32>
    %62 = arith.maximumf %60, %61 : vector<8x128xf32>
    %c0_34 = arith.constant 0 : index
    %c0_35 = arith.constant 0 : index
    %c0_36 = arith.constant 0 : index
    %63 = vector.load %arg12[%c0_34, %c0_35, %c0_36] : memref<1x8x128xf32, #tpu.memory_space<vmem>>, vector<1x8x128xf32>
    %64 = vector.shape_cast %63 : vector<1x8x128xf32> to vector<8x128xf32>
    %65 = vector.shape_cast %62 : vector<8x128xf32> to vector<1x8x128xf32>
    tpu.vector_store %arg12[%c0_34, %c0_35, %c0_36], %65 {strides = array<i32>} : memref<1x8x128xf32, #tpu.memory_space<vmem>>, vector<1x8x128xf32>,
    return
  }
  func.func @transform_0(%arg0: i32) -> (i32, i32, i32) {
    %c0_i32 = arith.constant 0 : i32
    %c0_i32_0 = arith.constant 0 : i32
    %c0_i32_1 = arith.constant 0 : i32
    return %arg0, %c0_i32, %c0_i32_0 : i32, i32, i32
  }
  func.func @transform_1(%arg0: i32) -> (i32, i32) {
    %c0_i32 = arith.constant 0 : i32
    %c0_i32_0 = arith.constant 0 : i32
    %c0_i32_1 = arith.constant 0 : i32
    return %c0_i32, %c0_i32_0 : i32, i32
  }
  func.func @transform_2(%arg0: i32) -> (i32, i32) {
    %c0_i32 = arith.constant 0 : i32
    %c0_i32_0 = arith.constant 0 : i32
    %c0_i32_1 = arith.constant 0 : i32
    return %c0_i32, %c0_i32_0 : i32, i32
  }
  func.func @transform_3(%arg0: i32) -> (i32, i32) {
    %c0_i32 = arith.constant 0 : i32
    %c0_i32_0 = arith.constant 0 : i32
    %c0_i32_1 = arith.constant 0 : i32
    return %c0_i32, %c0_i32_0 : i32, i32
  }
  func.func @transform_4(%arg0: i32) -> (i32, i32) {
    %c0_i32 = arith.constant 0 : i32
    %c0_i32_0 = arith.constant 0 : i32
    %c0_i32_1 = arith.constant 0 : i32
    return %c0_i32, %c0_i32_0 : i32, i32
  }
  func.func @transform_5(%arg0: i32) -> (i32, i32) {
    %c0_i32 = arith.constant 0 : i32
    %c0_i32_0 = arith.constant 0 : i32
    %c0_i32_1 = arith.constant 0 : i32
    return %c0_i32, %c0_i32_0 : i32, i32
  }
  func.func @transform_6(%arg0: i32) -> (i32, i32) {
    %c0_i32 = arith.constant 0 : i32
    %c0_i32_0 = arith.constant 0 : i32
    %c0_i32_1 = arith.constant 0 : i32
    return %c0_i32, %c0_i32_0 : i32, i32
  }
  func.func @transform_7(%arg0: i32) -> (i32, i32) {
    %c0_i32 = arith.constant 0 : i32
    %c0_i32_0 = arith.constant 0 : i32
    %c0_i32_1 = arith.constant 0 : i32
    return %c0_i32, %c0_i32_0 : i32, i32
  }
  func.func @transform_8(%arg0: i32) -> (i32, i32) {
    %c0_i32 = arith.constant 0 : i32
    %c0_i32_0 = arith.constant 0 : i32
    %c0_i32_1 = arith.constant 0 : i32
    return %c0_i32, %c0_i32_0 : i32, i32
  }
  func.func @transform_9(%arg0: i32) -> (i32, i32) {
    %c0_i32 = arith.constant 0 : i32
    %c0_i32_0 = arith.constant 0 : i32
    %c0_i32_1 = arith.constant 0 : i32
    return %c0_i32, %c0_i32_0 : i32, i32
  }
  func.func @transform_10(%arg0: i32) -> (i32, i32) {
    %c0_i32 = arith.constant 0 : i32
    %c0_i32_0 = arith.constant 0 : i32
    %c0_i32_1 = arith.constant 0 : i32
    return %c0_i32, %c0_i32_0 : i32, i32
  }
  func.func @transform_11(%arg0: i32) -> (i32, i32, i32) {
    %c0_i32 = arith.constant 0 : i32
    %c0_i32_0 = arith.constant 0 : i32
    %c0_i32_1 = arith.constant 0 : i32
    return %arg0, %c0_i32, %c0_i32_0 : i32, i32, i32
  }
}

module attributes {stable_mosaic.version = 11 : i64} {
  func.func @_dense_matmul_kernel(%arg0: i32, %arg1: i32, %arg2: memref<2x512xf32, #tpu.memory_space<vmem>>, %arg3: memref<512x256xbf16, #tpu.memory_space<vmem>>, %arg4: memref<1x256xf32, #tpu.memory_space<vmem>>, %arg5: memref<2x256xf32, #tpu.memory_space<vmem>>, %arg6: memref<2x256xf32, #tpu.memory_space<vmem>>) attributes {dimension_semantics = [#tpu.dimension_semantics<parallel>, #tpu.dimension_semantics<arbitrary>], iteration_bounds = array<i64: 1, 2>, scalar_prefetch = 0 : i64, scratch_operands = 1 : i64, tpu.core_type = #tpu.core_type<tc>, window_params = [{transform_indices = @transform_0, window_bounds = array<i64: 2, 512>}, {transform_indices = @transform_1, window_bounds = array<i64: 512, 256>}, {transform_indices = @transform_2, window_bounds = array<i64: 1, 256>}, {transform_indices = @transform_3, window_bounds = array<i64: 2, 256>}]} {
    %c0_i32 = arith.constant 0 : i32
    %0 = arith.cmpi eq, %arg1, %c0_i32 : i32
    %1 = arith.extui %0 : i1 to i32
    %c0_i32_0 = arith.constant 0 : i32
    %2 = arith.cmpi ne, %1, %c0_i32_0 : i32
    scf.if %2 {
      %cst_9 = arith.constant 0.000000e+00 : f32
      %13 = vector.broadcast %cst_9 : f32 to vector<2x256xf32>
      %c0_10 = arith.constant 0 : index
      %c0_11 = arith.constant 0 : index
      %14 = vector.load %arg6[%c0_10, %c0_11] : memref<2x256xf32, #tpu.memory_space<vmem>>, vector<2x256xf32>
      tpu.vector_store %arg6[%c0_10, %c0_11], %13 {strides = array<i32>} : memref<2x256xf32, #tpu.memory_space<vmem>>, vector<2x256xf32>,
    } else {
    }
    %c0 = arith.constant 0 : index
    %c0_1 = arith.constant 0 : index
    %3 = vector.load %arg6[%c0, %c0_1] : memref<2x256xf32, #tpu.memory_space<vmem>>, vector<2x256xf32>
    %c0_2 = arith.constant 0 : index
    %c0_3 = arith.constant 0 : index
    %4 = vector.load %arg2[%c0_2, %c0_3] : memref<2x512xf32, #tpu.memory_space<vmem>>, vector<2x512xf32>
    %5 = arith.truncf %4 : vector<2x512xf32> to vector<2x512xbf16>
    %c0_4 = arith.constant 0 : index
    %c0_5 = arith.constant 0 : index
    %6 = vector.load %arg3[%c0_4, %c0_5] : memref<512x256xbf16, #tpu.memory_space<vmem>>, vector<512x256xbf16>
    %cst = arith.constant dense<0.000000e+00> : vector<2x256xf32>
    %7 = tpu.matmul %5, %6, %cst {dimension_numbers = #tpu.dot_dimension_numbers<[1], [0], [0], [1], [0, 0, 1, 1], [], []>} : vector<2x512xbf16>, vector<512x256xbf16>, vector<2x256xf32> -> vector<2x256xf32>
    %8 = arith.addf %3, %7 : vector<2x256xf32>
    %c0_6 = arith.constant 0 : index
    %c0_7 = arith.constant 0 : index
    %9 = vector.load %arg6[%c0_6, %c0_7] : memref<2x256xf32, #tpu.memory_space<vmem>>, vector<2x256xf32>
    tpu.vector_store %arg6[%c0_6, %c0_7], %8 {strides = array<i32>} : memref<2x256xf32, #tpu.memory_space<vmem>>, vector<2x256xf32>,
    %c1_i32 = arith.constant 1 : i32
    %10 = arith.cmpi eq, %arg1, %c1_i32 : i32
    %11 = arith.extui %10 : i1 to i32
    %c0_i32_8 = arith.constant 0 : i32
    %12 = arith.cmpi ne, %11, %c0_i32_8 : i32
    scf.if %12 {
      %c0_9 = arith.constant 0 : index
      %c0_10 = arith.constant 0 : index
      %13 = vector.load %arg6[%c0_9, %c0_10] : memref<2x256xf32, #tpu.memory_space<vmem>>, vector<2x256xf32>
      %c0_11 = arith.constant 0 : index
      %c0_12 = arith.constant 0 : index
      %14 = vector.load %arg4[%c0_11, %c0_12] : memref<1x256xf32, #tpu.memory_space<vmem>>, vector<1x256xf32>
      %15 = vector.broadcast %14 : vector<1x256xf32> to vector<2x256xf32>
      %16 = arith.addf %13, %15 : vector<2x256xf32>
      %c0_13 = arith.constant 0 : index
      %c0_14 = arith.constant 0 : index
      %17 = vector.load %arg5[%c0_13, %c0_14] : memref<2x256xf32, #tpu.memory_space<vmem>>, vector<2x256xf32>
      tpu.vector_store %arg5[%c0_13, %c0_14], %16 {strides = array<i32>} : memref<2x256xf32, #tpu.memory_space<vmem>>, vector<2x256xf32>,
    } else {
    }
    return
  }
  func.func @transform_0(%arg0: i32, %arg1: i32) -> (i32, i32) {
    %c0_i32 = arith.constant 0 : i32
    %c0_i32_0 = arith.constant 0 : i32
    return %c0_i32, %arg1 : i32, i32
  }
  func.func @transform_1(%arg0: i32, %arg1: i32) -> (i32, i32) {
    %c0_i32 = arith.constant 0 : i32
    return %arg1, %arg0 : i32, i32
  }
  func.func @transform_2(%arg0: i32, %arg1: i32) -> (i32, i32) {
    %c0_i32 = arith.constant 0 : i32
    %c0_i32_0 = arith.constant 0 : i32
    return %c0_i32, %arg0 : i32, i32
  }
  func.func @transform_3(%arg0: i32, %arg1: i32) -> (i32, i32) {
    %c0_i32 = arith.constant 0 : i32
    %c0_i32_0 = arith.constant 0 : i32
    return %c0_i32, %arg0 : i32, i32
  }
}

module attributes {stable_mosaic.version = 11 : i64} {
  func.func @_dense_matmul_kernel(%arg0: i32, %arg1: i32, %arg2: memref<2x256xf32, #tpu.memory_space<vmem>>, %arg3: memref<256x256xbf16, #tpu.memory_space<vmem>>, %arg4: memref<1x256xf32, #tpu.memory_space<vmem>>, %arg5: memref<2x256xf32, #tpu.memory_space<vmem>>, %arg6: memref<2x256xf32, #tpu.memory_space<vmem>>) attributes {dimension_semantics = [#tpu.dimension_semantics<parallel>, #tpu.dimension_semantics<arbitrary>], iteration_bounds = array<i64: 1, 1>, scalar_prefetch = 0 : i64, scratch_operands = 1 : i64, tpu.core_type = #tpu.core_type<tc>, window_params = [{transform_indices = @transform_0, window_bounds = array<i64: 2, 256>}, {transform_indices = @transform_1, window_bounds = array<i64: 256, 256>}, {transform_indices = @transform_2, window_bounds = array<i64: 1, 256>}, {transform_indices = @transform_3, window_bounds = array<i64: 2, 256>}]} {
    %c0_i32 = arith.constant 0 : i32
    %0 = arith.cmpi eq, %arg1, %c0_i32 : i32
    %1 = arith.extui %0 : i1 to i32
    %c0_i32_0 = arith.constant 0 : i32
    %2 = arith.cmpi ne, %1, %c0_i32_0 : i32
    scf.if %2 {
      %cst_10 = arith.constant 0.000000e+00 : f32
      %13 = vector.broadcast %cst_10 : f32 to vector<2x256xf32>
      %c0_11 = arith.constant 0 : index
      %c0_12 = arith.constant 0 : index
      %14 = vector.load %arg6[%c0_11, %c0_12] : memref<2x256xf32, #tpu.memory_space<vmem>>, vector<2x256xf32>
      tpu.vector_store %arg6[%c0_11, %c0_12], %13 {strides = array<i32>} : memref<2x256xf32, #tpu.memory_space<vmem>>, vector<2x256xf32>,
    } else {
    }
    %c0 = arith.constant 0 : index
    %c0_1 = arith.constant 0 : index
    %3 = vector.load %arg6[%c0, %c0_1] : memref<2x256xf32, #tpu.memory_space<vmem>>, vector<2x256xf32>
    %c0_2 = arith.constant 0 : index
    %c0_3 = arith.constant 0 : index
    %4 = vector.load %arg2[%c0_2, %c0_3] : memref<2x256xf32, #tpu.memory_space<vmem>>, vector<2x256xf32>
    %5 = arith.truncf %4 : vector<2x256xf32> to vector<2x256xbf16>
    %c0_4 = arith.constant 0 : index
    %c0_5 = arith.constant 0 : index
    %6 = vector.load %arg3[%c0_4, %c0_5] : memref<256x256xbf16, #tpu.memory_space<vmem>>, vector<256x256xbf16>
    %cst = arith.constant dense<0.000000e+00> : vector<2x256xf32>
    %7 = tpu.matmul %5, %6, %cst {dimension_numbers = #tpu.dot_dimension_numbers<[1], [0], [0], [1], [0, 0, 1, 1], [], []>} : vector<2x256xbf16>, vector<256x256xbf16>, vector<2x256xf32> -> vector<2x256xf32>
    %8 = arith.addf %3, %7 : vector<2x256xf32>
    %c0_6 = arith.constant 0 : index
    %c0_7 = arith.constant 0 : index
    %9 = vector.load %arg6[%c0_6, %c0_7] : memref<2x256xf32, #tpu.memory_space<vmem>>, vector<2x256xf32>
    tpu.vector_store %arg6[%c0_6, %c0_7], %8 {strides = array<i32>} : memref<2x256xf32, #tpu.memory_space<vmem>>, vector<2x256xf32>,
    %c0_i32_8 = arith.constant 0 : i32
    %10 = arith.cmpi eq, %arg1, %c0_i32_8 : i32
    %11 = arith.extui %10 : i1 to i32
    %c0_i32_9 = arith.constant 0 : i32
    %12 = arith.cmpi ne, %11, %c0_i32_9 : i32
    scf.if %12 {
      %c0_10 = arith.constant 0 : index
      %c0_11 = arith.constant 0 : index
      %13 = vector.load %arg6[%c0_10, %c0_11] : memref<2x256xf32, #tpu.memory_space<vmem>>, vector<2x256xf32>
      %c0_12 = arith.constant 0 : index
      %c0_13 = arith.constant 0 : index
      %14 = vector.load %arg4[%c0_12, %c0_13] : memref<1x256xf32, #tpu.memory_space<vmem>>, vector<1x256xf32>
      %15 = vector.broadcast %14 : vector<1x256xf32> to vector<2x256xf32>
      %16 = arith.addf %13, %15 : vector<2x256xf32>
      %c0_14 = arith.constant 0 : index
      %c0_15 = arith.constant 0 : index
      %17 = vector.load %arg5[%c0_14, %c0_15] : memref<2x256xf32, #tpu.memory_space<vmem>>, vector<2x256xf32>
      tpu.vector_store %arg5[%c0_14, %c0_15], %16 {strides = array<i32>} : memref<2x256xf32, #tpu.memory_space<vmem>>, vector<2x256xf32>,
    } else {
    }
    return
  }
  func.func @transform_0(%arg0: i32, %arg1: i32) -> (i32, i32) {
    %c0_i32 = arith.constant 0 : i32
    %c0_i32_0 = arith.constant 0 : i32
    return %c0_i32, %arg1 : i32, i32
  }
  func.func @transform_1(%arg0: i32, %arg1: i32) -> (i32, i32) {
    %c0_i32 = arith.constant 0 : i32
    return %arg1, %arg0 : i32, i32
  }
  func.func @transform_2(%arg0: i32, %arg1: i32) -> (i32, i32) {
    %c0_i32 = arith.constant 0 : i32
    %c0_i32_0 = arith.constant 0 : i32
    return %c0_i32, %arg0 : i32, i32
  }
  func.func @transform_3(%arg0: i32, %arg1: i32) -> (i32, i32) {
    %c0_i32 = arith.constant 0 : i32
    %c0_i32_0 = arith.constant 0 : i32
    return %c0_i32, %arg0 : i32, i32
  }
}

</mosaic_0001>

<bundles_post_ra>
// kernel: cnn_network_seq_forward.4
= control target key start
LH: loop header
LB: loop body
LE: loop exit
PB: predicated region body
PF: predicated region fallthrough
CT: control target
= control target key end

     0   :  { %s1128_s12 = smov 0   ;;  %s1130_s13 = smov 0   ;;  %s1253_s0 = inlined_call_operand.vmem [shape: f32[2,1024], index: 0, kind: input, shape index: {}]   ;;  %s1254_s1 = inlined_call_operand.vmem [shape: bf16[1024,256], index: 1, kind: input, shape index: {}]   ;;  %s1255_s2 = inlined_call_operand.vmem [shape: f32[1,256], index: 2, kind: input, shape index: {}]   ;;  %s1256_s3 = inlined_call_operand.vmem [shape: f32[2,256], index: 3, kind: output, shape index: {}]  }
   0x1   :  { %s1132_s14 = smov 0  }
   0x2 LB: > { %s22_s15 = sadd.s32 1, %s1100_s13  ;;  %p880_p0 = scmp.ge.s32.totalorder %s1104_s14, 1  ;;  %s1104_s14 = sphi %s1132_s14, %s13_s14   ;;  %s1100_s13 = sphi %s1130_s13, %s1258_s13   ;;  %s1096_s12 = sphi %s1128_s12, %s1257_s12  }
   0x3   : > { %p23_p1 = scmp.ge.s32.totalorder %s22_s15, 2  ;;  %p179_p2 = scmp.lt.s32.totalorder %s1104_s14, 3 }
   0x5   : > { %s1260_s15 = smov (%p23_p1, %s22_s15), 0  ;;  %p180_p3 = pnand %p880_p0, %p179_p2 }
   0x6   : > { %s881_s16 = sshll.u32 (!%p180_p3), %s1096_s12, 2  ;;  %s883_s17 = sshll.u32 (!%p180_p3), %s1096_s12, 6 }
   0x7   : > { %183 = sbr.rel (%p180_p3) target bundleno = 322 (0x142), region = 32  ;;  %p218_p4 = scmp.lt.s32.totalorder (!%p180_p3), %s881_s16, 7 }
   0x8   : > { %p225_p5 = scmp.lt.s32.totalorder (!%p180_p3), %s883_s17, 127  ;;  %p886_p6 = scmp.ne.s32.totalorder (!%p180_p3), %s1096_s12, 0 }
   0xe   : > { %s1262_s16 = smov (!%p218_p4, %s881_s16), 7  ;;  %s1264_s17 = smov (!%p225_p5, %s883_s17), 127 }
   0xf   : > { %s882_s18 = sshll.u32 %s1262_s16, 1  ;;  %s956_s22 = sshll.u32 %s1264_s17, 3  ;;  %v1106_v0 = vmov (!%p886_p6), 0.0  }
  0x10   : > { %s1153_s21 = scalar_lea.vmem %s1253_s0, %s882_s18  ;;  %s1158_s25 = scalar_lea.vmem %s1254_s1, %s956_s22  ;;  %250 = vst [vmem:[#allocation2] sm:$0xf] (!%p886_p6), %v1106_v0 }
  0x11   : > { %249 = sbr.rel (%p886_p6) target bundleno = 24 (0x18), region = 36 }
  0x18 PF: > { %v985_v1 = vld [vmem:[%s1158_s25 + $0x4] ss:$8 sps:$4 sm:$0xff]   ;;  %v989_v3 = vld [vmem:[%s1158_s25] ss:$8 sps:$4 sm:$0xff]   ;;  %v991_v5 = vld [vmem:[%s1158_s25 + $0x14] ss:$8 sps:$4 sm:$0xff]   ;;  %v258_v39 = vlaneseq }
  0x19   : > { %v987_v2 = vld [vmem:[%s1158_s25 + $0x104] ss:$8 sps:$4 sm:$0xff]   ;;  %663 = vmatprep.subr.bf16.mxu1 %v985_v1  ;;  %v990_v4 = vld [vmem:[%s1158_s25 + $0x100] ss:$8 sps:$4 sm:$0xff]   ;;  %v993_v6 = vld [vmem:[%s1158_s25 + $0x114] ss:$8 sps:$4 sm:$0xff]  }
  0x1a   : > { %704 = vmatprep.subr.bf16.mxu0 %v987_v2  ;;  %664 = vmatpush1.bf16.msra.mxu1 %v989_v3  ;;  %v995_v7 = vld [vmem:[%s1158_s25 + $0x10] ss:$8 sps:$4 sm:$0xff]   ;;  %v997_v9 = vld [vmem:[%s1158_s25 + $0x24] ss:$8 sps:$4 sm:$0xff]   ;;  %v1001_v11 = vld [vmem:[%s1158_s25 + $0x20] ss:$8 sps:$4 sm:$0xff]  }
  0x1b   : > { %705 = vmatpush1.bf16.msra.mxu0 %v990_v4  ;;  %665 = vmatprep.subr.bf16.mxu1 %v991_v5  ;;  %v996_v8 = vld [vmem:[%s1158_s25 + $0x110] ss:$8 sps:$4 sm:$0xff]   ;;  %v999_v10 = vld [vmem:[%s1158_s25 + $0x124] ss:$8 sps:$4 sm:$0xff]   ;;  %v1002_v12 = vld [vmem:[%s1158_s25 + $0x120] ss:$8 sps:$4 sm:$0xff]  }
  0x1c   : > { %706 = vmatprep.subr.bf16.mxu0 %v993_v6  ;;  %v1003_v13 = vld [vmem:[%s1158_s25 + $0x34] ss:$8 sps:$4 sm:$0xff]   ;;  %v1007_v15 = vld [vmem:[%s1158_s25 + $0x30] ss:$8 sps:$4 sm:$0xff]   ;;  %v1009_v17 = vld [vmem:[%s1158_s25 + $0x44] ss:$8 sps:$4 sm:$0xff]  }
  0x1d   : > { %v1005_v14 = vld [vmem:[%s1158_s25 + $0x134] ss:$8 sps:$4 sm:$0xff]   ;;  %v1008_v16 = vld [vmem:[%s1158_s25 + $0x130] ss:$8 sps:$4 sm:$0xff]   ;;  %v1011_v18 = vld [vmem:[%s1158_s25 + $0x144] ss:$8 sps:$4 sm:$0xff]  }
  0x1e   : > { %666 = vmatpush1.bf16.msra.mxu1 %v995_v7  ;;  %v1013_v19 = vld [vmem:[%s1158_s25 + $0x40] ss:$8 sps:$4 sm:$0xff]   ;;  %v1015_v21 = vld [vmem:[%s1158_s25 + $0x54] ss:$8 sps:$4 sm:$0xff]   ;;  %v1019_v23 = vld [vmem:[%s1158_s25 + $0x50] ss:$8 sps:$4 sm:$0xff]  }
  0x1f   : > { %707 = vmatpush1.bf16.msra.mxu0 %v996_v8  ;;  %667 = vmatprep.subr.bf16.mxu1 %v997_v9  ;;  %v1014_v20 = vld [vmem:[%s1158_s25 + $0x140] ss:$8 sps:$4 sm:$0xff]   ;;  %v1017_v22 = vld [vmem:[%s1158_s25 + $0x154] ss:$8 sps:$4 sm:$0xff]   ;;  %v1020_v24 = vld [vmem:[%s1158_s25 + $0x150] ss:$8 sps:$4 sm:$0xff]  }
  0x20   : > { %708 = vmatprep.subr.bf16.mxu0 %v999_v10  ;;  %v1021_v25 = vld [vmem:[%s1158_s25 + $0x64] ss:$8 sps:$4 sm:$0xff]   ;;  %v1025_v27 = vld [vmem:[%s1158_s25 + $0x60] ss:$8 sps:$4 sm:$0xff]   ;;  %v1027_v29 = vld [vmem:[%s1158_s25 + $0x74] ss:$8 sps:$4 sm:$0xff]  }
  0x21   : > { %v1023_v26 = vld [vmem:[%s1158_s25 + $0x164] ss:$8 sps:$4 sm:$0xff]   ;;  %v1026_v28 = vld [vmem:[%s1158_s25 + $0x160] ss:$8 sps:$4 sm:$0xff]   ;;  %v1029_v30 = vld [vmem:[%s1158_s25 + $0x174] ss:$8 sps:$4 sm:$0xff]  }
  0x22   : > { %668 = vmatpush1.bf16.msra.mxu1 %v1001_v11  ;;  %v1031_v31 = vld [vmem:[%s1158_s25 + $0x70] ss:$8 sps:$4 sm:$0xff]   ;;  %v1033_v33 = vld [vmem:[%s1158_s25 + $0x84] ss:$8 sps:$4 sm:$0xff]   ;;  %v1037_v35 = vld [vmem:[%s1158_s25 + $0x80] ss:$8 sps:$4 sm:$0xff]  }
  0x23   : > { %709 = vmatpush1.bf16.msra.mxu0 %v1002_v12  ;;  %669 = vmatprep.subr.bf16.mxu1 %v1003_v13  ;;  %v1032_v32 = vld [vmem:[%s1158_s25 + $0x170] ss:$8 sps:$4 sm:$0xff]   ;;  %v1035_v34 = vld [vmem:[%s1158_s25 + $0x184] ss:$8 sps:$4 sm:$0xff]   ;;  %v1038_v36 = vld [vmem:[%s1158_s25 + $0x180] ss:$8 sps:$4 sm:$0xff]  }
  0x24   : > { %710 = vmatprep.subr.bf16.mxu0 %v1005_v14  ;;  %v1107_v37 = vmov 1983009808   ;;  %v1039_v40 = vld [vmem:[%s1158_s25 + $0x94] ss:$8 sps:$4 sm:$0xff]   ;;  %v1043_v42 = vld [vmem:[%s1158_s25 + $0x90] ss:$8 sps:$4 sm:$0xff]  }
  0x25   : > { %v256_v38 = vunpack.c.l.s4 %v1107_v37  ;;  %v1041_v41 = vld [vmem:[%s1158_s25 + $0x194] ss:$8 sps:$4 sm:$0xff]   ;;  %v1200_v44 = vshrl.u32 %v258_v39, 7  ;;  %v1044_v45 = vld [vmem:[%s1158_s25 + $0x190] ss:$8 sps:$4 sm:$0xff]   ;;  %v252_v53 = vld [vmem:[%s1153_s21] sm:$0xff] }
  0x26   : > { %670 = vmatpush1.bf16.msra.mxu1 %v1007_v15  ;;  %v1045_v46 = vld [vmem:[%s1158_s25 + $0xa4] ss:$8 sps:$4 sm:$0xff]   ;;  %v1049_v48 = vld [vmem:[%s1158_s25 + $0xa0] ss:$8 sps:$4 sm:$0xff]   ;;  %v1051_v51 = vld [vmem:[%s1158_s25 + $0xb4] ss:$8 sps:$4 sm:$0xff]   ;;  %v254_v55 = vcombine.high %v252_v53, %v252_v53 }
  0x27   : > { %711 = vmatpush1.bf16.msra.mxu0 %v1008_v16  ;;  %671 = vmatprep.subr.bf16.mxu1 %v1009_v17  ;;  %v257_v43 = vunpack.c.0.s8 %v256_v38  ;;  %v1047_v47 = vld [vmem:[%s1158_s25 + $0x1a4] ss:$8 sps:$4 sm:$0xff]   ;;  %v1050_v49 = vld [vmem:[%s1158_s25 + $0x1a0] ss:$8 sps:$4 sm:$0xff]   ;;  %v1053_v52 = vld [vmem:[%s1158_s25 + $0x1b4] ss:$8 sps:$4 sm:$0xff]  }
  0x28   : > { %712 = vmatprep.subr.bf16.mxu0 %v1011_v18  ;;  %v1055_v56 = vld [vmem:[%s1158_s25 + $0xb0] ss:$8 sps:$4 sm:$0xff]   ;;  %v1057_v58 = vld [vmem:[%s1158_s25 + $0xc4] ss:$8 sps:$4 sm:$0xff]   ;;  %v1061_v0 = vld [vmem:[%s1158_s25 + $0xc0] ss:$8 sps:$4 sm:$0xff]  }
  0x29   : > { %v1208_v50 = vsub.s32 %v257_v43, %v1200_v44  ;;  %v1056_v57 = vld [vmem:[%s1158_s25 + $0x1b0] ss:$8 sps:$4 sm:$0xff]   ;;  %v1059_v59 = vld [vmem:[%s1158_s25 + $0x1c4] ss:$8 sps:$4 sm:$0xff]   ;;  %v1062_v1 = vld [vmem:[%s1158_s25 + $0x1c0] ss:$8 sps:$4 sm:$0xff]  }
  0x2a   : > { %672 = vmatpush1.bf16.msra.mxu1 %v1013_v19  ;;  %v1063_v2 = vld [vmem:[%s1158_s25 + $0xd4] ss:$8 sps:$4 sm:$0xff]   ;;  %v1067_v5 = vld [vmem:[%s1158_s25 + $0xd0] ss:$8 sps:$4 sm:$0xff]   ;;  %v1069_v7 = vld [vmem:[%s1158_s25 + $0xe4] ss:$8 sps:$4 sm:$0xff]  }
  0x2b   : > { %713 = vmatpush1.bf16.msra.mxu0 %v1014_v20  ;;  %673 = vmatprep.subr.bf16.mxu1 %v1015_v21  ;;  %v261_v54 = vrot.slane %v252_v53, %v1208_v50  ;;  %v268_v61 = vrot.slane %v254_v55, %v1208_v50  ;;  %v1065_v3 = vld [vmem:[%s1158_s25 + $0x1d4] ss:$8 sps:$4 sm:$0xff]   ;;  %v1068_v6 = vld [vmem:[%s1158_s25 + $0x1d0] ss:$8 sps:$4 sm:$0xff]   ;;  %v1071_v8 = vld [vmem:[%s1158_s25 + $0x1e4] ss:$8 sps:$4 sm:$0xff]  }
  0x2c   : > { %714 = vmatprep.subr.bf16.mxu0 %v1017_v22  ;;  %v1073_v9 = vld [vmem:[%s1158_s25 + $0xe0] ss:$8 sps:$4 sm:$0xff]   ;;  %v1075_v11 = vld [vmem:[%s1158_s25 + $0xf4] ss:$8 sps:$4 sm:$0xff]   ;;  %v1079_v13 = vld [vmem:[%s1158_s25 + $0xf0] ss:$8 sps:$4 sm:$0xff]  }
  0x2d   : > { %v269_v60 = vcombine.high %v261_v54, %v261_v54  ;;  %v270_v63 = vcombine.high %v268_v61, %v268_v61  ;;  %v1074_v10 = vld [vmem:[%s1158_s25 + $0x1e0] ss:$8 sps:$4 sm:$0xff]   ;;  %v1077_v12 = vld [vmem:[%s1158_s25 + $0x1f4] ss:$8 sps:$4 sm:$0xff]   ;;  %v1080_v14 = vld [vmem:[%s1158_s25 + $0x1f0] ss:$8 sps:$4 sm:$0xff]   ;;  %v275_v15 = vpack.c.bf16 %v261_v54, %v261_v54  ;;  %v277_v16 = vpack.c.bf16 %v268_v61, %v268_v61 }
  0x2e   : > { %674 = vmatpush1.bf16.msra.mxu1 %v1019_v23  ;;  %p951_p7 = scmp.ne.s32.totalorder %s1096_s12, 1 }
  0x2f   : > { %715 = vmatpush1.bf16.msra.mxu0 %v1020_v24  ;;  %675 = vmatprep.subr.bf16.mxu1 %v1021_v25  ;;  %v276_v62 = vpack.c.bf16 %v269_v60, %v269_v60  ;;  %v278_v4 = vpack.c.bf16 %v270_v63, %v270_v63 }
  0x30   : > { %716 = vmatprep.subr.bf16.mxu0 %v1023_v26 }
  0x31   : > { %695 = vmatprep.mubr.bf16.mxu1 %v276_v62  ;;  %736 = vmatprep.mubr.bf16.mxu0 %v278_v4 }
  0x32   : > { %676 = vmatpush1.bf16.msra.mxu1 %v1025_v27 }
  0x33   : > { %717 = vmatpush1.bf16.msra.mxu0 %v1026_v28  ;;  %677 = vmatprep.subr.bf16.mxu1 %v1027_v29  ;;  %v251_v28 = vld [vmem:[#allocation2] sm:$0xf] }
  0x34   : > { %718 = vmatprep.subr.bf16.mxu0 %v1029_v30 }
  0x36   : > { %678 = vmatpush1.bf16.msra.mxu1 %v1031_v31  ;;  %v763_v31 = vld [vmem:[%s1255_s2] sm:$0x3] (!%p951_p7) }
  0x37   : > { %719 = vmatpush1.bf16.msra.mxu0 %v1032_v32  ;;  %679 = vmatprep.subr.bf16.mxu1 %v1033_v33  ;;  %v767_v32 = vsub.s32 (!%p951_p7), 0, %v1200_v44  ;;  %v771_v33 = vsub.s32 (!%p951_p7), 1, %v1200_v44 }
  0x38   : > { %720 = vmatprep.subr.bf16.mxu0 %v1035_v34 }
  0x39   : > { %v768_v34 = vrot.slane (!%p951_p7), %v763_v31, %v767_v32 }
  0x3a   : > { %680 = vmatpush1.bf16.msra.mxu1 %v1037_v35  ;;  %v772_v35 = vrot.slane (!%p951_p7), %v763_v31, %v771_v33 }
  0x3b   : > { %721 = vmatpush1.bf16.msra.mxu0 %v1038_v36  ;;  %681 = vmatprep.subr.bf16.mxu1 %v1039_v40 }
  0x3c   : > { %722 = vmatprep.subr.bf16.mxu0 %v1041_v41  ;;  %v773_v36 = vcombine.low (!%p951_p7), %v768_v34, %v772_v35 }
  0x3e   : > { %682 = vmatpush1.bf16.msra.mxu1 %v1043_v42  ;;  %v780_v38 = vrot.slane (!%p951_p7), %v773_v36, %v1208_v50 }
  0x3f   : > { %723 = vmatpush1.bf16.msra.mxu0 %v1044_v45  ;;  %683 = vmatprep.subr.bf16.mxu1 %v1045_v46 }
  0x40   : > { %724 = vmatprep.subr.bf16.mxu0 %v1047_v47 }
  0x42   : > { %684 = vmatpush1.bf16.msra.mxu1 %v1049_v48 }
  0x43   : > { %725 = vmatpush1.bf16.msra.mxu0 %v1050_v49  ;;  %685 = vmatprep.subr.bf16.mxu1 %v1051_v51 }
  0x44   : > { %726 = vmatprep.subr.bf16.mxu0 %v1053_v52 }
  0x46   : > { %686 = vmatpush1.bf16.msra.mxu1 %v1055_v56 }
  0x47   : > { %727 = vmatpush1.bf16.msra.mxu0 %v1056_v57  ;;  %687 = vmatprep.subr.bf16.mxu1 %v1057_v58 }
  0x48   : > { %728 = vmatprep.subr.bf16.mxu0 %v1059_v59 }
  0x4a   : > { %688 = vmatpush1.bf16.msra.mxu1 %v1061_v0 }
  0x4b   : > { %729 = vmatpush1.bf16.msra.mxu0 %v1062_v1  ;;  %689 = vmatprep.subr.bf16.mxu1 %v1063_v2 }
  0x4c   : > { %730 = vmatprep.subr.bf16.mxu0 %v1065_v3 }
  0x4e   : > { %690 = vmatpush1.bf16.msra.mxu1 %v1067_v5 }
  0x4f   : > { %731 = vmatpush1.bf16.msra.mxu0 %v1068_v6  ;;  %691 = vmatprep.subr.bf16.mxu1 %v1069_v7 }
  0x50   : > { %732 = vmatprep.subr.bf16.mxu0 %v1071_v8 }
  0x52   : > { %692 = vmatpush1.bf16.msra.mxu1 %v1073_v9 }
  0x53   : > { %733 = vmatpush1.bf16.msra.mxu0 %v1074_v10  ;;  %693 = vmatprep.subr.bf16.mxu1 %v1075_v11 }
  0x54   : > { %734 = vmatprep.subr.bf16.mxu0 %v1077_v12 }
  0x56   : > { %694 = vmatpush1.bf16.msra.mxu1 %v1079_v13 }
  0x57   : > { %735 = vmatpush1.bf16.msra.mxu0 %v1080_v14 }
  0x59   : > { %696 = vmatmul.mubr.bf16.vlgmr.msra.gmra.mrb[0].mxu1 %v275_v15 }
  0x5a   : > { %737 = vmatmul.mubr.bf16.vlgmr.msra.gmra.mrb[0].mxu0 %v277_v16 }
 0x12c   : > { %v697_v17 = vpop.f32.mrb[0].mxu1 }
 0x12d   : > { %v738_v18 = vpop.f32.mrb[0].mxu0  ;;  %v699_v20 = vpop.f32.mrb[1].mxu1 }
 0x12e   : > { %v739_v19 = vadd.f32 %v738_v18, %v697_v17  ;;  %v740_v21 = vpop.f32.mrb[1].mxu0  ;;  %v701_v23 = vpop.f32.mrb[2].mxu1 }
 0x12f   : > { %v741_v22 = vadd.f32 %v740_v21, %v699_v20  ;;  %v742_v24 = vpop.f32.mrb[2].mxu0  ;;  %v702_v25 = vpop.f32.mrb[3].mxu1 }
 0x130   : > { %v743_v26 = vpop.f32.mrb[3].mxu0 }
 0x131   : > { %v747_v27 = vcombine.low %v739_v19, %v741_v22  ;;  %761 = sbr.rel (%p951_p7) target bundleno = 322 (0x142), region = 40 }
 0x133   : > { %v754_v29 = vrot.slane %v747_v27, %v1208_v50 }
 0x135   : > { %v756_v30 = vadd.f32 %v754_v29, %v251_v28 }
 0x137   : > { %757 = vst [vmem:[#allocation2] sm:$0xf] %v756_v30 }
 0x13e   : > { %v762_v37 = vld [vmem:[#allocation2] sm:$0xf] }
 0x13f   : > { %v782_v39 = vadd.f32 %v780_v38, %v762_v37 }
 0x141   : > { %783 = vst [vmem:[%s1256_s3] sm:$0xf] %v782_v39 }
 0x142 PF: > { %s13_s14 = sadd.s32 1, %s1104_s14   ;;  %s1257_s12 = smov %s1100_s13 }
 0x143   : > { %p10_p8 = scmp.ge.s32.totalorder %s13_s14, 4   ;;  %s1258_s13 = smov %s1260_s15 }
 0x145   :  { %12 = sbr.rel (!%p10_p8) target bundleno = 2 (0x2), region = 76 }

// kernel: cnn_network_seq_forward.3
= control target key start
LH: loop header
LB: loop body
LE: loop exit
PB: predicated region body
PF: predicated region fallthrough
CT: control target
= control target key end

     0   :  { %16 = vsyncpa [#allocation3], 0  ;;  %s2440_s17 = smov 0   ;;  %s3185_s0 = inlined_call_operand.vmem [shape: f32[2,64,12], index: 0, kind: input, shape index: {}]   ;;  %s3186_s1 = inlined_call_operand.vmem [shape: f32[36,32], index: 1, kind: input, shape index: {}]   ;;  %s3187_s2 = inlined_call_operand.vmem [shape: f32[1,32], index: 2, kind: input, shape index: {}]   ;;  %s3188_s3 = inlined_call_operand.vmem [shape: f32[1,32], index: 3, kind: input, shape index: {}]   ;;  %s3189_s4 = inlined_call_operand.vmem [shape: f32[160,64], index: 4, kind: input, shape index: {}]   ;;  %s3190_s5 = inlined_call_operand.vmem [shape: f32[1,64], index: 5, kind: input, shape index: {}]   ;;  %s3191_s6 = inlined_call_operand.vmem [shape: f32[1,64], index: 6, kind: input, shape index: {}]   ;;  %s3192_s7 = inlined_call_operand.vmem [shape: f32[1,64], index: 7, kind: input, shape index: {}]   ;;  %s3193_s8 = inlined_call_operand.hbm [shape: f32[192,128], index: 8, kind: input, shape index: {}]   ;;  %s3194_s9 = inlined_call_operand.vmem [shape: f32[1,128], index: 9, kind: input, shape index: {}]   ;;  %s3195_s10 = inlined_call_operand.vmem [shape: f32[1,128], index: 10, kind: input, shape index: {}]   ;;  %s3196_s11 = inlined_call_operand.vmem [shape: f32[2,8,128], index: 11, kind: output, shape index: {}]  }
   0x1 LB: > { %s2446_s18 = sadd.s32 4294967295, %s2368_s17   ;;  %p2145_p0 = scmp.ge.s32.totalorder %s2368_s17, 1  ;;  %s2368_s17 = sphi %s2440_s17, %s22_s17  }
   0x2   : > { %p289_p1 = scmp.lt.s32.totalorder %s2368_s17, 3  ;;  %s2370_s19 = smov [#allocation2]  }
   0x3   : > { %s322_s20 = sshll.u32 %s2370_s19, 4  ;;  %p3197_p3 = scmp.eq.s32.totalorder %s2446_s18, 0  ;;  %s323_s20 = int_to_ptr.vmem [resolvable:$true] %s322_s20 }
   0x4   : > { %p2450_p2 = pnand %p2145_p0, %p289_p1  ;;  %s2330_s25 = scalar_lea.hbm %s3193_s8, 3072 }
   0x5   : > { %p2331_p6 = scmp.ne.s32.totalorder %s3193_s8, %s2330_s25  ;;  %p2337_p10 = scmp.lt.u32.totalorder %s2330_s25, %s3193_s8 }
   0x6   : > { %s3199_s21 = scalar_select %p2450_p2, 1, 0 }
   0x7   : > { %p2291_p4 = pneg %p2450_p2 }
   0x9   : > { %p2459_p5 = pnand %p3197_p3, %p2291_p4 }
   0xb   : > { %p2332_p7 = pneg %p2459_p5 }
   0xd   : > { %p2333_p8 = pnand %p2332_p7, %p2331_p6 }
   0xf   : > { %p2334_p9 = pneg %p2333_p8 }
  0x11   : > { %p2339_p11 = pnand %p2337_p10, %p2334_p9 }
  0x13   : > { %2342 = shalt.err (!%p2339_p11)
}
  0x14   : > { %s2343_s30 = scalar_lea.vmem %s323_s20, 3072  ;;  %p2351_p1 = scmp.lt.s32.totalorder %s323_s20, %s323_s20 }
  0x15   : > { %p2344_p12 = scmp.ne.s32.totalorder %s323_s20, %s2343_s30  ;;  %p2352_p4 = scmp.lt.s32.totalorder %s2343_s30, %s2343_s30 }
  0x17   : > { %p2346_p13 = pnand %p2344_p12, %p2332_p7  ;;  %p2353_p3 = por %p2352_p4, %p2351_p1 }
  0x19   : > { %p2347_p0 = pneg %p2346_p13 }
  0x1b   : > { %p2354_p2 = pnand %p2353_p3, %p2347_p0 }
  0x1d   : > { %2357 = shalt.err (!%p2354_p2)
}
  0x1e   : > { %s2371_s12 = smov 128   ;;  %s2372_s13 = smov 8  }
  0x1f   : > { %2294 = dma.hbm_to_vmem [thread:$0]  (!%p2459_p5), %s3193_s8, 3072, %s323_s20, [#allocation3], %s2371_s12, %s2371_s12, %s2372_s13  }
  0x20   : > { %p3201_p6 = scmp.ne.s32.totalorder %s3199_s21, 0 }
  0x21   : > { %p3202_p8 = scmp.eq.s32.totalorder (!%p3201_p6), %s2446_s18, 0 }
  0x22   : > { %352 = sbr.rel (%p3201_p6) target bundleno = 1252 (0x4e4), region = 64 }
  0x29   : > { %2363 = dma.done.wait (%p3202_p8), [#allocation3], 3072   ;;  %p3203_p7 = pmov %p3202_p8 }
  0x2a   : > { %p391_p2 = scmp.lt.s32.totalorder %s2446_s18, 1  ;;  %vm421_vm0 = vcmask 1040384   ;;  %vm492_vm1 = vcmask 1045504   ;;  %vm450_vm2 = vcmask 1046528   ;;  %s2373_s21 = smov 24   ;;  %v408_v25 = vld [vmem:[%s3186_s1] sm:$0xff] }
  0x2b   : > { %2365 = vsyncadd (%p3203_p7), [#allocation3], 4294964224  ;;  %s2374_s23 = smov 12   ;;  %v409_v26 = vld [vmem:[%s3186_s1 + $0x8] sm:$0xff]  ;;  %v410_v31 = vld [vmem:[%s3186_s1 + $0x10] sm:$0xff]  ;;  %vm577_vm3 = vcmask 1043456  }
  0x2c   : > { %s3205_s18 = smov (!%p391_p2, %s2446_s18), 1  ;;  %v411_v32 = vld [vmem:[%s3186_s1 + $0x18] sm:$0xff]  ;;  %v2213_v35 = vpack.c.bf16 %v409_v26, %v408_v25  ;;  %v412_v44 = vld [vmem:[%s3186_s1 + $0x20] sm:$0xf]  ;;  %vm534_vm4 = vcmask 97280   ;;  %vm543_vm5 = vcmask 195584  }
  0x2d   : > { %s2177_s16 = sshll.u32 %s3205_s18, 6  ;;  %v2217_v36 = vpack.c.bf16 %v411_v32, %v410_v31  ;;  %vm552_vm6 = vcmask 293888   ;;  %vm892_vm7 = vcmask 254976   ;;  %vm1244_vm8 = vcmask 1041409   ;;  %s2377_s27 = smov 64  }
  0x2e   : > { %s2493_s20 = scalar_lea.vmem %s3185_s0, %s2177_s16  ;;  %2214 = vmatprep.subr.bf16.mxu0 %v2213_v35  ;;  %vm1234_vm9 = vcmask 1043459   ;;  %vm1246_vm10 = vcmask 1042434   ;;  %vm1236_vm11 = vcmask 1044484   ;;  %vm1238_vm12 = vcmask 1045509   ;;  %s2378_s28 = smov 32  }
  0x2f   : > { %v400_v0 = vld [vmem:[%s2493_s20] sm:$0xff]  ;;  %v401_v1 = vld [vmem:[%s2493_s20 + $0x8] sm:$0xff]  ;;  %v402_v2 = vld [vmem:[%s2493_s20 + $0x10] sm:$0xff]  ;;  %2216 = vmatpush3.bf16.msra.mxu0 %v2213_v35  ;;  %vm1240_vm13 = vcmask 1046534   ;;  %vm1242_vm14 = vcmask 1047559   ;;  %vm1273_vm15 = vcmask 1041408  }
  0x30   : > { %v422_v3 = vrot.slane %v400_v0, 7  ;;  %v423_v4 = vrot.slane %v401_v1, 7  ;;  %v425_v5 = vrot.slane %v402_v2, 7  ;;  %v403_v6 = vld [vmem:[%s2493_s20 + $0x18] sm:$0xff]  ;;  %v404_v7 = vld [vmem:[%s2493_s20 + $0x20] sm:$0xff]  ;;  %v405_v23 = vld [vmem:[%s2493_s20 + $0x28] sm:$0xff]  ;;  %2218 = vmatprep.subr.bf16.mxu0 %v2217_v36 }
  0x31   : > { %v427_v8 = vrot.slane %v403_v6, 7  ;;  %v429_v9 = vrot.slane %v404_v7, 7  ;;  %v406_v24 = vld [vmem:[%s2493_s20 + $0x30] sm:$0xff]  ;;  %v431_v33 = vrot.slane %v405_v23, 7  ;;  %v407_v43 = vld [vmem:[%s2493_s20 + $0x38] sm:$0xff]  ;;  %v1183_v35 = vld [vmem:[%s3189_s4 + $0x8] sm:$0xff] }
  0x32   : > { %v2501_v10 = vsel %vm421_vm0, %v422_v3, %v423_v4  ;;  %v2504_v11 = vsel %vm421_vm0, 0.0, %v422_v3  ;;  %v2507_v12 = vsel %vm421_vm0, %v423_v4, %v425_v5  ;;  %v433_v34 = vrot.slane %v406_v24, 7  ;;  %s2379_s29 = smov 96  }
  0x33   : > { %v493_v13 = vrot.slane %v2504_v11, 2  ;;  %v494_v14 = vrot.slane %v2501_v10, 2  ;;  %v451_v15 = vrot.slane %v2504_v11, 1  ;;  %v452_v16 = vrot.slane %v2501_v10, 1  ;;  %2220 = vmatpush3.bf16.msra.mxu0 %v2217_v36  ;;  %v1184_v36 = vld [vmem:[%s3189_s4 + $0x10] sm:$0xff] }
  0x34   : > { %v496_v17 = vrot.slane %v2507_v12, 2  ;;  %v454_v18 = vrot.slane %v2507_v12, 1  ;;  %v2516_v19 = vsel %vm421_vm0, %v425_v5, %v427_v8  ;;  %v2519_v20 = vsel %vm421_vm0, %v427_v8, %v429_v9  ;;  %2199 = vmatprep.subr.msk.mxu0 %vm577_vm3, %v412_v44 }
  0x35   : > { %v495_v21 = vsel %vm492_vm1, %v493_v13, %v494_v14  ;;  %v453_v22 = vsel %vm450_vm2, %v451_v15, %v452_v16  ;;  %v456_v29 = vrot.slane %v2516_v19, 1  ;;  %v458_v30 = vrot.slane %v2519_v20, 1 }
  0x36   : > { %510 = vrot.lane.b32.xlu1 %v495_v21, %s2373_s21  ;;  %468 = vrot.lane.b32.xlu0 %v453_v22, %s2374_s23  ;;  %v497_v27 = vsel %vm492_vm1, %v494_v14, %v496_v17  ;;  %v455_v28 = vsel %vm450_vm2, %v452_v16, %v454_v18  ;;  %v498_v39 = vrot.slane %v2516_v19, 2  ;;  %v500_v40 = vrot.slane %v2519_v20, 2 }
  0x37   : > { %v459_v37 = vsel %vm450_vm2, %v456_v29, %v458_v30  ;;  %v457_v38 = vsel %vm450_vm2, %v454_v18, %v456_v29  ;;  %v2550_v41 = vsel %vm421_vm0, %v429_v9, %v431_v33  ;;  %v2553_v42 = vsel %vm421_vm0, %v431_v33, %v433_v34  ;;  %2200 = vmatpush3.msk.msra.mxu0 %vm577_vm3, %v412_v44  ;;  %v1186_v44 = vld [vmem:[%s3189_s4 + $0x20] sm:$0xff] }
  0x38   : > { %v501_v45 = vsel %vm492_vm1, %v498_v39, %v500_v40  ;;  %v499_v46 = vsel %vm492_vm1, %v496_v17, %v498_v39  ;;  %v460_v47 = vrot.slane %v2550_v41, 1  ;;  %v462_v48 = vrot.slane %v2553_v42, 1 }
  0x39   : > { %v435_v49 = vrot.slane %v407_v43, 7  ;;  %v502_v52 = vrot.slane %v2550_v41, 2  ;;  %v504_v53 = vrot.slane %v2553_v42, 2  ;;  %v728_v39 = vlaneseq }
  0x3a   : > { %512 = vrot.lane.b32.xlu1 %v497_v27, %s2373_s21  ;;  %470 = vrot.lane.b32.xlu0 %v455_v28, %s2374_s23  ;;  %v463_v50 = vsel %vm450_vm2, %v460_v47, %v462_v48  ;;  %v461_v51 = vsel %vm450_vm2, %v458_v30, %v460_v47 }
  0x3b   : > { %v436_v54 = vsel %vm421_vm0, %v433_v34, %v435_v49  ;;  %v447_v55 = vsel %vm421_vm0, %v435_v49, 0.0  ;;  %v505_v56 = vsel %vm492_vm1, %v502_v52, %v504_v53  ;;  %v503_v57 = vsel %vm492_vm1, %v500_v40, %v502_v52  ;;  %v1182_v34 = vld [vmem:[%s3189_s4] sm:$0xff]  ;;  %v1188_v52 = vld [vmem:[%s3189_s4 + $0x30] sm:$0xff] }
  0x3c   : > { %v464_v58 = vrot.slane %v436_v54, 1  ;;  %v466_v59 = vrot.slane %v447_v55, 1  ;;  %v506_v62 = vrot.slane %v436_v54, 2  ;;  %v508_v63 = vrot.slane %v447_v55, 2 }
  0x3d   : > { %v2376_v40 = vmov 0.0|0.0   ;;  %v729_v47 = vshrl.u32 %v728_v39, 7 }
  0x3e   : > { %474 = vrot.lane.b32.xlu1 %v459_v37, %s2374_s23  ;;  %472 = vrot.lane.b32.xlu0 %v457_v38, %s2374_s23  ;;  %v465_v60 = vsel %vm450_vm2, %v462_v48, %v464_v58  ;;  %v467_v61 = vsel %vm450_vm2, %v464_v58, %v466_v59  ;;  %v507_v0 = vsel %vm492_vm1, %v504_v53, %v506_v62  ;;  %v2375_v37 = vmov 1983009808   ;;  %v2644_v48 = vld [vmem:[%s3187_s2] ss:$0 sm:$0xff]  ;;  %v1189_v53 = vld [vmem:[%s3189_s4 + $0x38] sm:$0xff] }
  0x3f   : > { %v509_v1 = vsel %vm492_vm1, %v506_v62, %v508_v63  ;;  %v726_v38 = vunpack.c.l.s4 %v2375_v37  ;;  %2221 = vmatprep.subr.bf16.mxu1 %v2376_v40  ;;  %2251 = vmatprep.subr.bf16.mxu0 %v2376_v40  ;;  %v1190_v58 = vld [vmem:[%s3189_s4 + $0x40] sm:$0xff]  ;;  %v1191_v59 = vld [vmem:[%s3189_s4 + $0x48] sm:$0xff]  ;;  %v2231_v62 = vpack.c.bf16 %v1189_v53, %v1188_v52  ;;  %v1193_v63 = vld [vmem:[%s3189_s4 + $0x58] sm:$0xff] }
  0x42   : > { %516 = vrot.lane.b32.xlu1 %v501_v45, %s2373_s21  ;;  %514 = vrot.lane.b32.xlu0 %v499_v46, %s2373_s21  ;;  %v1187_v45 = vld [vmem:[%s3189_s4 + $0x28] sm:$0xff]  ;;  %v727_v46 = vunpack.c.0.s8 %v726_v38 }
  0x43   : > { %v2228_v49 = vpack.c.bf16 %v1187_v45, %v1186_v44 }
  0x44   : > { %v2659_v55 = vsub.s32 %v727_v46, %v729_v47 }
  0x46   : > { %478 = vrot.lane.b32.xlu1 %v463_v50, %s2374_s23  ;;  %476 = vrot.lane.b32.xlu0 %v461_v51, %s2374_s23  ;;  %v2649_v51 = vld [vmem:[%s3188_s3] ss:$0 sm:$0xff] }
  0x4a   : > { %520 = vrot.lane.b32.xlu1 %v505_v56, %s2373_s21  ;;  %518 = vrot.lane.b32.xlu0 %v503_v57, %s2373_s21 }
  0x4e   : > { %480 = vrot.lane.b32.xlu0 %v465_v60, %s2374_s23  ;;  %482 = vrot.lane.b32.xlu1 %v467_v61, %s2374_s23  ;;  %v1192_v60 = vld [vmem:[%s3189_s4 + $0x50] sm:$0xff]  ;;  %s2152_s23 = sshll.u32 %s3205_s18, 3 }
  0x4f   : > { %s399_s26 = scalar_lea.vmem %s3196_s11, %s2152_s23 }
  0x52   : > { %522 = vrot.lane.b32.xlu0 %v507_v0, %s2373_s21  ;;  %524 = vrot.lane.b32.xlu1 %v509_v1, %s2373_s21  ;;  %v2678_v0 = vld [vmem:[%s3189_s4 + $0x60] sm:$0xff]  ;;  %v2683_v1 = vld [vmem:[%s3189_s4 + $0x68] sm:$0xff] }
  0xa8   : > { %v511_v2 = vpop.permute.xlu1 %510  ;;  %v469_v3 = vpop.permute.xlu0 %468 }
  0xa9   : > { %v535_v4 = vsel %vm534_vm4, %v2504_v11, %v469_v3  ;;  %v2690_v3 = vld [vmem:[%s3189_s4 + $0x70] sm:$0xff] }
  0xaa   : > { %v544_v5 = vsel %vm543_vm5, %v535_v4, %v511_v2  ;;  %v2695_v4 = vld [vmem:[%s3189_s4 + $0x78] sm:$0xff] }
  0xab   : > { %2201 = vmatprep.mubr.msk.f32.mxu0 %vm552_vm6, %v544_v5 }
  0xac   : > { %v513_v6 = vpop.permute.xlu1 %512  ;;  %v471_v7 = vpop.permute.xlu0 %470 }
  0xad   : > { %v536_v8 = vsel %vm534_vm4, %v2501_v10, %v471_v7  ;;  %v2234_v7 = vpack.c.bf16 %v1191_v59, %v1190_v58 }
  0xae   : > { %v545_v9 = vsel %vm543_vm5, %v536_v8, %v513_v6 }
  0xaf   : > { %2202 = vmatmul.mubr.msk.f32.vlgmr.msra.gmra.mrb[0].mxu0 %vm552_vm6, %v545_v9 }
  0xb0   : > { %v475_v13 = vpop.permute.xlu1 %474  ;;  %v473_v14 = vpop.permute.xlu0 %472 }
  0xb1   : > { %v538_v15 = vsel %vm534_vm4, %v2516_v19, %v475_v13  ;;  %v537_v11 = vsel %vm534_vm4, %v2507_v12, %v473_v14  ;;  %v2237_v13 = vpack.c.bf16 %v1193_v63, %v1192_v60  ;;  %v2240_v14 = vpack.c.bf16 %v2683_v1, %v2678_v0 }
  0xb4   : > { %v517_v16 = vpop.permute.xlu1 %516  ;;  %v515_v17 = vpop.permute.xlu0 %514 }
  0xb5   : > { %v547_v18 = vsel %vm543_vm5, %v538_v15, %v517_v16  ;;  %v546_v21 = vsel %vm543_vm5, %v537_v11, %v515_v17  ;;  %v2243_v17 = vpack.c.bf16 %v2695_v4, %v2690_v3 }
  0xb6   : > { %2204 = vmatprep.mubr.msk.f32.mxu0 %vm552_vm6, %v546_v21 }
  0xb7   : > { %2205 = vmatmul.mubr.msk.f32.gmra.mrb[2].mxu0 %vm552_vm6, %v547_v18 }
  0xb8   : > { %v479_v10 = vpop.permute.xlu1 %478  ;;  %v477_v22 = vpop.permute.xlu0 %476 }
  0xb9   : > { %v540_v23 = vsel %vm534_vm4, %v2550_v41, %v479_v10  ;;  %v539_v19 = vsel %vm534_vm4, %v2519_v20, %v477_v22  ;;  %v2222_v41 = vpack.c.bf16 %v1183_v35, %v1182_v34 }
  0xbb   : > { %2223 = vmatpush1.bf16.msra.mxu1 %v2222_v41 }
  0xbc   : > { %v521_v24 = vpop.permute.xlu1 %520  ;;  %v519_v12 = vpop.permute.xlu0 %518  ;;  %2224 = vmatprep.subr.bf16.mxu1 %v2376_v40 }
  0xbd   : > { %v549_v25 = vsel %vm543_vm5, %v540_v23, %v521_v24  ;;  %v548_v26 = vsel %vm543_vm5, %v539_v19, %v519_v12 }
  0xbe   : > { %2207 = vmatprep.mubr.msk.f32.mxu0 %vm552_vm6, %v548_v26 }
  0xbf   : > { %2208 = vmatmul.mubr.msk.f32.gmra.mrb[4].mxu0 %vm552_vm6, %v549_v25 }
  0xc0   : > { %v481_v27 = vpop.permute.xlu0 %480  ;;  %v483_v28 = vpop.permute.xlu1 %482 }
  0xc1   : > { %v541_v29 = vsel %vm534_vm4, %v2553_v42, %v481_v27  ;;  %v542_v30 = vsel %vm534_vm4, %v436_v54, %v483_v28  ;;  %v1185_v42 = vld [vmem:[%s3189_s4 + $0x18] sm:$0xff]  ;;  %vm1351_vm4 = vcmask 261120  }
  0xc2   : > { %v2225_v43 = vpack.c.bf16 %v1185_v42, %v1184_v36 }
  0xc4   : > { %v523_v31 = vpop.permute.xlu0 %522  ;;  %v525_v32 = vpop.permute.xlu1 %524  ;;  %2226 = vmatpush1.bf16.msra.mxu1 %v2225_v43 }
  0xc5   : > { %v550_v20 = vsel %vm543_vm5, %v541_v29, %v523_v31  ;;  %v551_v33 = vsel %vm543_vm5, %v542_v30, %v525_v32  ;;  %2227 = vmatprep.subr.bf16.mxu1 %v2376_v40  ;;  %vm1320_vm5 = vcmask 1044480  }
  0xc6   : > { %2210 = vmatprep.mubr.msk.f32.mxu0 %vm552_vm6, %v550_v20 }
  0xc7   : > { %2211 = vmatmul.mubr.msk.f32.gmra.mrb[6].mxu0 %vm552_vm6, %v551_v33  ;;  %vm1356_vm6 = vcmask 523264  }
  0xc8   : > { %2229 = vmatpush1.bf16.msra.mxu1 %v2228_v49 }
  0xc9   : > { %2230 = vmatprep.subr.bf16.mxu1 %v2376_v40 }
  0xcc   : > { %2232 = vmatpush1.bf16.msra.mxu1 %v2231_v62 }
  0xcd   : > { %2233 = vmatprep.subr.bf16.mxu1 %v2376_v40 }
  0xd0   : > { %2235 = vmatpush1.bf16.msra.mxu1 %v2234_v7 }
  0xd1   : > { %2236 = vmatprep.subr.bf16.mxu1 %v2376_v40 }
  0xd4   : > { %2238 = vmatpush1.bf16.msra.mxu1 %v2237_v13 }
  0xd5   : > { %2239 = vmatprep.subr.bf16.mxu1 %v2376_v40 }
  0xd8   : > { %2241 = vmatpush1.bf16.msra.mxu1 %v2240_v14 }
  0xd9   : > { %2242 = vmatprep.subr.bf16.mxu1 %v2376_v40 }
  0xdc   : > { %2244 = vmatpush1.bf16.msra.mxu1 %v2243_v17 }
  0xdd   : > { %2245 = vmatprep.subr.bf16.mxu1 %v2376_v40 }
 0x182   : > { %v2203_v50 = vpop.f32.mrb[0].mxu0 }
 0x183   : > { %v694_v54 = vmul.f32 %v2203_v50, %v2644_v48  ;;  %v647_v56 = vpop.f32.mrb[1].mxu0 }
 0x184   : > { %v693_v57 = vmul.f32 %v2644_v48, %v647_v56 }
 0x185   : > { %v709_v61 = vadd.f32 %v2649_v51, %v694_v54 }
 0x186   : > { %v708_v2 = vadd.f32 %v2649_v51, %v693_v57 }
 0x187   : > { %v741_v5 = vcombine.high %v709_v61, %v709_v61  ;;  %v748_v6 = vrot.slane %v709_v61, %v2659_v55 }
 0x188   : > { %v724_v8 = vcombine.high %v708_v2, %v708_v2  ;;  %v731_v9 = vrot.slane %v708_v2, %v2659_v55 }
 0x189   : > { %v755_v15 = vrot.slane %v741_v5, %v2659_v55  ;;  %v756_v11 = vcombine.high %v748_v6, %v748_v6  ;;  %v921_v16 = vsel %vm892_vm7, %v748_v6, 0.0 }
 0x18a   : > { %v922_v18 = vrot.slane %v921_v16, 4  ;;  %v738_v21 = vrot.slane %v724_v8, %v2659_v55  ;;  %v739_v10 = vcombine.high %v731_v9, %v731_v9  ;;  %v893_v22 = vsel %vm892_vm7, %v731_v9, 0.0  ;;  %v2707_v23 = vpop.f32.mrb[2].mxu0 }
 0x18b   : > { %v757_v19 = vcombine.high %v755_v15, %v755_v15  ;;  %v928_v24 = vsel %vm892_vm7, %v756_v11, 0.0  ;;  %v935_v12 = vsel %vm892_vm7, %v755_v15, 0.0  ;;  %v894_v25 = vrot.slane %v893_v22, 4  ;;  %v2712_v26 = vpop.f32.mrb[3].mxu0 }
 0x18c   : > { %v923_v27 = vadd.f32 %v922_v18, %v921_v16  ;;  %v929_v28 = vrot.slane %v928_v24, 4  ;;  %v936_v29 = vrot.slane %v935_v12, 4  ;;  %v740_v30 = vcombine.high %v738_v21, %v738_v21 }
 0x18d   : > { %v942_v31 = vsel %vm892_vm7, %v757_v19, 0.0  ;;  %v895_v32 = vadd.f32 %v894_v25, %v893_v22  ;;  %v900_v20 = vsel %vm892_vm7, %v739_v10, 0.0  ;;  %v907_v33 = vsel %vm892_vm7, %v738_v21, 0.0 }
 0x18e   : > { %v924_v34 = vrot.slane %v923_v27, 2  ;;  %v930_v35 = vadd.f32 %v929_v28, %v928_v24  ;;  %v937_v36 = vadd.f32 %v936_v29, %v935_v12  ;;  %v943_v37 = vrot.slane %v942_v31, 4 }
 0x18f   : > { %v896_v38 = vrot.slane %v895_v32, 2  ;;  %v901_v39 = vrot.slane %v900_v20, 4  ;;  %v908_v41 = vrot.slane %v907_v33, 4  ;;  %v914_v42 = vsel %vm892_vm7, %v740_v30, 0.0 }
 0x190   : > { %v925_v43 = vadd.f32 %v924_v34, %v923_v27  ;;  %v931_v44 = vrot.slane %v930_v35, 2  ;;  %v938_v45 = vrot.slane %v937_v36, 2  ;;  %v944_v46 = vadd.f32 %v943_v37, %v942_v31 }
 0x191   : > { %v897_v47 = vadd.f32 %v896_v38, %v895_v32  ;;  %v902_v49 = vadd.f32 %v901_v39, %v900_v20  ;;  %v909_v50 = vadd.f32 %v908_v41, %v907_v33  ;;  %v915_v52 = vrot.slane %v914_v42, 4 }
 0x192   : > { %v926_v53 = vrot.slane %v925_v43, 1  ;;  %v932_v54 = vadd.f32 %v931_v44, %v930_v35  ;;  %v939_v56 = vadd.f32 %v938_v45, %v937_v36  ;;  %v945_v57 = vrot.slane %v944_v46, 2  ;;  %v2209_v58 = vpop.f32.mrb[4].mxu0 }
 0x193   : > { %v898_v59 = vrot.slane %v897_v47, 1  ;;  %v903_v60 = vrot.slane %v902_v49, 2  ;;  %v910_v61 = vrot.slane %v909_v50, 2  ;;  %v916_v62 = vadd.f32 %v915_v52, %v914_v42  ;;  %v667_v63 = vpop.f32.mrb[5].mxu0 }
 0x194   : > { %v927_v0 = vadd.f32 %v926_v53, %v925_v43  ;;  %v933_v1 = vrot.slane %v932_v54, 1  ;;  %v940_v2 = vrot.slane %v939_v56, 1  ;;  %v946_v5 = vadd.f32 %v945_v57, %v944_v46 }
 0x195   : > { %v899_v6 = vadd.f32 %v898_v59, %v897_v47  ;;  %v904_v7 = vadd.f32 %v903_v60, %v902_v49  ;;  %v911_v8 = vadd.f32 %v910_v61, %v909_v50  ;;  %v917_v9 = vrot.slane %v916_v62, 2 }
 0x196   : > { %v934_v13 = vadd.f32 %v933_v1, %v932_v54  ;;  %v941_v15 = vadd.f32 %v940_v2, %v939_v56  ;;  %v947_v11 = vrot.slane %v946_v5, 1  ;;  %v2720_v16 = vmul.f32 0.5, %v927_v0 }
 0x197   : > { %v905_v18 = vrot.slane %v904_v7, 1  ;;  %v912_v21 = vrot.slane %v911_v8, 1  ;;  %v918_v10 = vadd.f32 %v917_v9, %v916_v62  ;;  %v2725_v24 = vmul.f32 0.5, %v899_v6 }
 0x198   : > { %v948_v22 = vadd.f32 %v947_v11, %v946_v5  ;;  %v2723_v19 = vmul.f32 0.5, %v934_v13  ;;  %v1124_v12 = vmul.f32 0.5, %v941_v15  ;;  %v1154_v29 = vmax.f32 %v2720_v16, 0.0 }
 0x199   : > { %v906_v25 = vadd.f32 %v905_v18, %v904_v7  ;;  %v913_v27 = vadd.f32 %v912_v21, %v911_v8  ;;  %v919_v28 = vrot.slane %v918_v10, 1  ;;  %v696_v30 = vmul.f32 %v2707_v23, %v2644_v48 }
 0x19a   : > { %v1125_v14 = vmul.f32 0.5, %v948_v22  ;;  %v2733_v31 = vpop.f32.mrb[6].mxu0  ;;  %v695_v3 = vmul.f32 %v2644_v48, %v2712_v26  ;;  %v1150_v34 = vmax.f32 %v2725_v24, 0.0  ;;  %v698_v23 = vmul.f32 %v2209_v58, %v2644_v48 }
 0x19b   : > { %v920_v32 = vadd.f32 %v919_v28, %v918_v10  ;;  %v2736_v20 = vmul.f32 0.5, %v906_v25  ;;  %v2738_v33 = vmul.f32 0.5, %v913_v27  ;;  %v2742_v4 = vpop.f32.mrb[7].mxu0  ;;  %v711_v35 = vadd.f32 %v2649_v51, %v696_v30 }
 0x19c   : > { %v1157_v17 = vmax.f32 %v1125_v14, 0.0  ;;  %v1155_v36 = vmax.f32 %v2723_v19, 0.0  ;;  %v1156_v37 = vmax.f32 %v1124_v12, 0.0  ;;  %v710_v38 = vadd.f32 %v2649_v51, %v695_v3 }
 0x19d   : > { %v2750_v39 = vmul.f32 %v2644_v48, %v667_v63  ;;  %v2752_v41 = vmul.f32 0.5, %v920_v32  ;;  %v1151_v26 = vmax.f32 %v2736_v20, 0.0  ;;  %v775_v42 = vcombine.high %v711_v35, %v711_v35 }
 0x19e   : > { %v782_v43 = vrot.slane %v711_v35, %v2659_v55  ;;  %v2757_v44 = vsel %vm1244_vm8, %v1157_v17, %v1156_v37  ;;  %v1152_v45 = vmax.f32 %v2738_v33, 0.0  ;;  %v758_v46 = vcombine.high %v710_v38, %v710_v38 }
 0x19f   : > { %v765_v47 = vrot.slane %v710_v38, %v2659_v55  ;;  %v789_v49 = vrot.slane %v775_v42, %v2659_v55  ;;  %v2764_v53 = vadd.f32 %v2649_v51, %v698_v23 }
 0x1a0   : > { %v790_v50 = vcombine.high %v782_v43, %v782_v43  ;;  %v977_v52 = vsel %vm892_vm7, %v782_v43, 0.0  ;;  %v772_v56 = vrot.slane %v758_v46, %v2659_v55 }
 0x1a1   : > { %v978_v54 = vrot.slane %v977_v52, 4  ;;  %v773_v57 = vcombine.high %v765_v47, %v765_v47  ;;  %v949_v58 = vsel %vm892_vm7, %v765_v47, 0.0  ;;  %v791_v59 = vcombine.high %v789_v49, %v789_v49 }
 0x1a2   : > { %v984_v60 = vsel %vm892_vm7, %v790_v50, 0.0  ;;  %v991_v61 = vsel %vm892_vm7, %v789_v49, 0.0  ;;  %v950_v62 = vrot.slane %v949_v58, 4  ;;  %v774_v2 = vcombine.high %v772_v56, %v772_v56 }
 0x1a3   : > { %v979_v63 = vadd.f32 %v978_v54, %v977_v52  ;;  %v985_v0 = vrot.slane %v984_v60, 4  ;;  %v992_v1 = vrot.slane %v991_v61, 4  ;;  %v998_v5 = vsel %vm892_vm7, %v791_v59, 0.0 }
 0x1a4   : > { %v951_v6 = vadd.f32 %v950_v62, %v949_v58  ;;  %v956_v7 = vsel %vm892_vm7, %v773_v57, 0.0  ;;  %v963_v8 = vsel %vm892_vm7, %v772_v56, 0.0  ;;  %v999_v11 = vrot.slane %v998_v5, 4 }
 0x1a5   : > { %v980_v9 = vrot.slane %v979_v63, 2  ;;  %v986_v13 = vadd.f32 %v985_v0, %v984_v60  ;;  %v993_v15 = vadd.f32 %v992_v1, %v991_v61  ;;  %v957_v21 = vrot.slane %v956_v7, 4 }
 0x1a6   : > { %v952_v18 = vrot.slane %v951_v6, 2  ;;  %v964_v10 = vrot.slane %v963_v8, 4  ;;  %v970_v22 = vsel %vm892_vm7, %v774_v2, 0.0  ;;  %v1000_v28 = vadd.f32 %v999_v11, %v998_v5 }
 0x1a7   : > { %v981_v12 = vadd.f32 %v980_v9, %v979_v63  ;;  %v987_v25 = vrot.slane %v986_v13, 2  ;;  %v994_v27 = vrot.slane %v993_v15, 2  ;;  %v958_v30 = vadd.f32 %v957_v21, %v956_v7 }
 0x1a8   : > { %v953_v14 = vadd.f32 %v952_v18, %v951_v6  ;;  %v965_v32 = vadd.f32 %v964_v10, %v963_v8  ;;  %v971_v3 = vrot.slane %v970_v22, 4  ;;  %v1001_v37 = vrot.slane %v1000_v28, 2 }
 0x1a9   : > { %v982_v17 = vrot.slane %v981_v12, 1  ;;  %v988_v35 = vadd.f32 %v987_v25, %v986_v13  ;;  %v995_v23 = vadd.f32 %v994_v27, %v993_v15  ;;  %v959_v42 = vrot.slane %v958_v30, 2 }
 0x1aa   : > { %v954_v38 = vrot.slane %v953_v14, 1  ;;  %v966_v43 = vrot.slane %v965_v32, 2  ;;  %v972_v46 = vadd.f32 %v971_v3, %v970_v22  ;;  %v1002_v52 = vadd.f32 %v1001_v37, %v1000_v28 }
 0x1ab   : > { %v983_v47 = vadd.f32 %v982_v17, %v981_v12  ;;  %v989_v49 = vrot.slane %v988_v35, 1  ;;  %v996_v50 = vrot.slane %v995_v23, 1  ;;  %v960_v56 = vadd.f32 %v959_v42, %v958_v30 }
 0x1ac   : > { %v955_v54 = vadd.f32 %v954_v38, %v953_v14  ;;  %v967_v57 = vadd.f32 %v966_v43, %v965_v32  ;;  %v973_v58 = vrot.slane %v972_v46, 2  ;;  %v1003_v61 = vrot.slane %v1002_v52, 1 }
 0x1ad   : > { %v990_v59 = vadd.f32 %v989_v49, %v988_v35  ;;  %v997_v60 = vadd.f32 %v996_v50, %v995_v23  ;;  %v2774_v62 = vmul.f32 0.5, %v983_v47  ;;  %v961_v63 = vrot.slane %v960_v56, 1 }
 0x1ae   : > { %v968_v0 = vrot.slane %v967_v57, 1  ;;  %v974_v1 = vadd.f32 %v973_v58, %v972_v46  ;;  %v1126_v2 = vmul.f32 0.5, %v955_v54  ;;  %v1004_v5 = vadd.f32 %v1003_v61, %v1002_v52 }
 0x1af   : > { %v2776_v6 = vmul.f32 0.5, %v990_v59  ;;  %v2778_v7 = vmul.f32 0.5, %v997_v60  ;;  %v809_v8 = vcombine.high %v2764_v53, %v2764_v53  ;;  %v962_v9 = vadd.f32 %v961_v63, %v960_v56 }
 0x1b0   : > { %v969_v13 = vadd.f32 %v968_v0, %v967_v57  ;;  %v975_v15 = vrot.slane %v974_v1, 1  ;;  %v1158_v11 = vmax.f32 %v1126_v2, 0.0  ;;  %v1153_v18 = vmax.f32 %v2752_v41, 0.0 }
 0x1b1   : > { %v2788_v21 = vsel %vm1234_vm9, %v1151_v26, %v1150_v34  ;;  %v2790_v10 = vmul.f32 0.5, %v1004_v5  ;;  %v816_v22 = vrot.slane %v2764_v53, %v2659_v55  ;;  %v1162_v12 = vmax.f32 %v2774_v62, 0.0 }
 0x1b2   : > { %v976_v25 = vadd.f32 %v975_v15, %v974_v1  ;;  %v1127_v27 = vmul.f32 0.5, %v962_v9  ;;  %v1247_v28 = vsel %vm1246_vm10, %v1158_v11, %v2757_v44  ;;  %v1163_v14 = vmax.f32 %v2776_v6, 0.0 }
 0x1b3   : > { %v823_v24 = vrot.slane %v809_v8, %v2659_v55  ;;  %v824_v20 = vcombine.high %v816_v22, %v816_v22  ;;  %v1033_v34 = vsel %vm892_vm7, %v816_v22, 0.0  ;;  %v1164_v26 = vmax.f32 %v2778_v7, 0.0 }
 0x1b4   : > { %v2801_v30 = vmul.f32 0.5, %v969_v13  ;;  %v1159_v32 = vmax.f32 %v1127_v27, 0.0  ;;  %v1034_v53 = vrot.slane %v1033_v34, 4  ;;  %v1165_v3 = vmax.f32 %v2790_v10, 0.0 }
 0x1b5   : > { %v825_v17 = vcombine.high %v823_v24, %v823_v24  ;;  %v1040_v35 = vsel %vm892_vm7, %v824_v20, 0.0  ;;  %v1047_v44 = vsel %vm892_vm7, %v823_v24, 0.0  ;;  %v2806_v23 = vmul.f32 0.5, %v976_v25 }
 0x1b6   : > { %v2809_v37 = vsel %vm1234_vm9, %v1159_v32, %v1247_v28  ;;  %v1035_v38 = vadd.f32 %v1034_v53, %v1033_v34  ;;  %v1041_v42 = vrot.slane %v1040_v35, 4  ;;  %v1048_v43 = vrot.slane %v1047_v44, 4 }
 0x1b7   : > { %v1054_v46 = vsel %vm892_vm7, %v825_v17, 0.0  ;;  %v712_v47 = vadd.f32 %v2649_v51, %v2750_v39  ;;  %v700_v49 = vmul.f32 %v2733_v31, %v2644_v48  ;;  %v1160_v50 = vmax.f32 %v2801_v30, 0.0 }
 0x1b8   : > { %v1036_v52 = vrot.slane %v1035_v38, 2  ;;  %v1042_v54 = vadd.f32 %v1041_v42, %v1040_v35  ;;  %v1055_v56 = vrot.slane %v1054_v46, 4  ;;  %v1049_v57 = vadd.f32 %v1048_v43, %v1047_v44 }
 0x1b9   : > { %v792_v58 = vcombine.high %v712_v47, %v712_v47  ;;  %v799_v59 = vrot.slane %v712_v47, %v2659_v55  ;;  %v699_v60 = vmul.f32 %v2644_v48, %v2742_v4  ;;  %v715_v39 = vadd.f32 %v2649_v51, %v700_v49 }
 0x1ba   : > { %v1037_v61 = vadd.f32 %v1036_v52, %v1035_v38  ;;  %v1043_v63 = vrot.slane %v1042_v54, 2  ;;  %v1056_v0 = vadd.f32 %v1055_v56, %v1054_v46  ;;  %v1050_v1 = vrot.slane %v1049_v57, 2 }
 0x1bb   : > { %v806_v31 = vrot.slane %v792_v58, %v2659_v55  ;;  %v807_v2 = vcombine.high %v799_v59, %v799_v59  ;;  %v1005_v5 = vsel %vm892_vm7, %v799_v59, 0.0  ;;  %v1253_v46 = vsel %vm1244_vm8, %v1165_v3, %v1164_v26 }
 0x1bc   : > { %v1038_v7 = vrot.slane %v1037_v61, 1  ;;  %v1044_v8 = vadd.f32 %v1043_v63, %v1042_v54  ;;  %v1057_v9 = vrot.slane %v1056_v0, 2  ;;  %v1006_v13 = vrot.slane %v1005_v5, 4 }
 0x1bd   : > { %v1051_v15 = vadd.f32 %v1050_v1, %v1049_v57  ;;  %v808_v11 = vcombine.high %v806_v31, %v806_v31  ;;  %v1012_v10 = vsel %vm892_vm7, %v807_v2, 0.0  ;;  %v1019_v48 = vsel %vm892_vm7, %v806_v31, 0.0 }
 0x1be   : > { %v1039_v4 = vadd.f32 %v1038_v7, %v1037_v61  ;;  %v1045_v22 = vrot.slane %v1044_v8, 1  ;;  %v1058_v25 = vadd.f32 %v1057_v9, %v1056_v0  ;;  %v1007_v27 = vadd.f32 %v1006_v13, %v1005_v5 }
 0x1bf   : > { %v1052_v28 = vrot.slane %v1051_v15, 1  ;;  %v1013_v24 = vrot.slane %v1012_v10, 4  ;;  %v1020_v20 = vrot.slane %v1019_v48, 4  ;;  %v1026_v34 = vsel %vm892_vm7, %v808_v11, 0.0 }
 0x1c0   : > { %v1046_v32 = vadd.f32 %v1045_v22, %v1044_v8  ;;  %v1059_v53 = vrot.slane %v1058_v25, 1  ;;  %v2826_v17 = vmul.f32 0.5, %v1039_v4  ;;  %v1008_v35 = vrot.slane %v1007_v27, 2 }
 0x1c1   : > { %v1053_v44 = vadd.f32 %v1052_v28, %v1051_v15  ;;  %v1014_v38 = vadd.f32 %v1013_v24, %v1012_v10  ;;  %v1021_v42 = vadd.f32 %v1020_v20, %v1019_v48  ;;  %v1027_v43 = vrot.slane %v1026_v34, 4 }
 0x1c2   : > { %v1161_v47 = vmax.f32 %v2806_v23, 0.0  ;;  %v1060_v49 = vadd.f32 %v1059_v53, %v1058_v25  ;;  %v1009_v52 = vadd.f32 %v1008_v35, %v1007_v27  ;;  %v2832_v59 = vmul.f32 0.5, %v1046_v32 }
 0x1c3   : > { %v2830_v54 = vmul.f32 0.5, %v1053_v44  ;;  %v1015_v56 = vrot.slane %v1014_v38, 2  ;;  %v1022_v57 = vrot.slane %v1021_v42, 2  ;;  %v1028_v58 = vadd.f32 %v1027_v43, %v1026_v34 }
 0x1c4   : > { %v1010_v61 = vrot.slane %v1009_v52, 1  ;;  %v843_v63 = vcombine.high %v715_v39, %v715_v39  ;;  %v714_v0 = vadd.f32 %v2649_v51, %v699_v60  ;;  %v1170_v1 = vmax.f32 %v2826_v17, 0.0 }
 0x1c5   : > { %v1016_v31 = vadd.f32 %v1015_v56, %v1014_v38  ;;  %v1023_v2 = vadd.f32 %v1022_v57, %v1021_v42  ;;  %v1029_v26 = vrot.slane %v1028_v58, 2  ;;  %v2836_v3 = vmul.f32 0.5, %v1060_v49 }
 0x1c6   : > { %v1011_v5 = vadd.f32 %v1010_v61, %v1009_v52  ;;  %v850_v7 = vrot.slane %v715_v39, %v2659_v55  ;;  %v857_v8 = vrot.slane %v843_v63, %v2659_v55  ;;  %v1172_v9 = vmax.f32 %v2830_v54, 0.0 }
 0x1c7   : > { %v1017_v13 = vrot.slane %v1016_v31, 1  ;;  %v1024_v15 = vrot.slane %v1023_v2, 1  ;;  %v1030_v11 = vadd.f32 %v1029_v26, %v1028_v58  ;;  %v826_v48 = vcombine.high %v714_v0, %v714_v0 }
 0x1c8   : > { %v1134_v10 = vmul.f32 0.5, %v1011_v5  ;;  %v858_v51 = vcombine.high %v850_v7, %v850_v7  ;;  %v859_v60 = vcombine.high %v857_v8, %v857_v8  ;;  %v1089_v27 = vsel %vm892_vm7, %v850_v7, 0.0 }
 0x1c9   : > { %v1018_v4 = vadd.f32 %v1017_v13, %v1016_v31  ;;  %v1025_v22 = vadd.f32 %v1024_v15, %v1023_v2  ;;  %v1031_v25 = vrot.slane %v1030_v11, 1  ;;  %v1090_v24 = vrot.slane %v1089_v27, 4 }
 0x1ca   : > { %v1166_v28 = vmax.f32 %v1134_v10, 0.0  ;;  %v1096_v39 = vsel %vm892_vm7, %v858_v51, 0.0  ;;  %v1103_v20 = vsel %vm892_vm7, %v857_v8, 0.0  ;;  %v1110_v43 = vsel %vm892_vm7, %v859_v60, 0.0 }
 0x1cb   : > { %v1032_v34 = vadd.f32 %v1031_v25, %v1030_v11  ;;  %v1135_v32 = vmul.f32 0.5, %v1018_v4  ;;  %v1136_v53 = vmul.f32 0.5, %v1025_v22  ;;  %v1097_v35 = vrot.slane %v1096_v39, 4 }
 0x1cc   : > { %v1254_v44 = vsel %vm1246_vm10, %v1166_v28, %v1253_v46  ;;  %v1091_v38 = vadd.f32 %v1090_v24, %v1089_v27  ;;  %v1104_v42 = vrot.slane %v1103_v20, 4  ;;  %v1173_v49 = vmax.f32 %v2836_v3, 0.0 }
 0x1cd   : > { %v1167_v52 = vmax.f32 %v1135_v32, 0.0  ;;  %v1168_v56 = vmax.f32 %v1136_v53, 0.0  ;;  %v1098_v57 = vadd.f32 %v1097_v35, %v1096_v39  ;;  %v1111_v63 = vrot.slane %v1110_v43, 4 }
 0x1ce   : > { %v1092_v58 = vrot.slane %v1091_v38, 2  ;;  %v1105_v61 = vadd.f32 %v1104_v42, %v1103_v20  ;;  %v833_v31 = vrot.slane %v714_v0, %v2659_v55  ;;  %v1137_v2 = vmul.f32 0.5, %v1032_v34 }
 0x1cf   : > { %v1255_v26 = vsel %vm1234_vm9, %v1167_v52, %v1254_v44  ;;  %v1099_v5 = vrot.slane %v1098_v57, 2  ;;  %v840_v46 = vrot.slane %v826_v48, %v2659_v55  ;;  %v1112_v15 = vadd.f32 %v1111_v63, %v1110_v43 }
 0x1d0   : > { %v1256_v7 = vsel %vm1236_vm11, %v1168_v56, %v1255_v26  ;;  %v1093_v8 = vadd.f32 %v1092_v58, %v1091_v38  ;;  %v1106_v13 = vrot.slane %v1105_v61, 2  ;;  %v841_v11 = vcombine.high %v833_v31, %v833_v31 }
 0x1d1   : > { %v1100_v3 = vadd.f32 %v1099_v5, %v1098_v57  ;;  %v842_v10 = vcombine.high %v840_v46, %v840_v46  ;;  %v1061_v51 = vsel %vm892_vm7, %v833_v31, 0.0  ;;  %v1113_v4 = vrot.slane %v1112_v15, 2 }
 0x1d2   : > { %v1094_v60 = vrot.slane %v1093_v8, 1  ;;  %v1107_v0 = vadd.f32 %v1106_v13, %v1105_v61  ;;  %v1062_v22 = vrot.slane %v1061_v51, 4  ;;  %v1068_v48 = vsel %vm892_vm7, %v841_v11, 0.0 }
 0x1d3   : > { %v1101_v25 = vrot.slane %v1100_v3, 1  ;;  %v1075_v27 = vsel %vm892_vm7, %v840_v46, 0.0  ;;  %v1082_v28 = vsel %vm892_vm7, %v842_v10, 0.0  ;;  %v1114_v20 = vadd.f32 %v1113_v4, %v1112_v15 }
 0x1d4   : > { %v1095_v24 = vadd.f32 %v1094_v60, %v1093_v8  ;;  %v1108_v39 = vrot.slane %v1107_v0, 1  ;;  %v1063_v34 = vadd.f32 %v1062_v22, %v1061_v51  ;;  %v1069_v53 = vrot.slane %v1068_v48, 4 }
 0x1d5   : > { %v1102_v32 = vadd.f32 %v1101_v25, %v1100_v3  ;;  %v1076_v35 = vrot.slane %v1075_v27, 4  ;;  %v1083_v44 = vrot.slane %v1082_v28, 4  ;;  %v1171_v38 = vmax.f32 %v2832_v59, 0.0 }
 0x1d6   : > { %v1109_v42 = vadd.f32 %v1108_v39, %v1107_v0  ;;  %v1115_v43 = vrot.slane %v1114_v20, 1  ;;  %v1064_v52 = vrot.slane %v1063_v34, 2  ;;  %v1260_v56 = vsel %vm1244_vm8, %v1173_v49, %v1172_v9 }
 0x1d7   : > { %v1070_v57 = vadd.f32 %v1069_v53, %v1068_v48  ;;  %v1077_v58 = vadd.f32 %v1076_v35, %v1075_v27  ;;  %v1084_v61 = vadd.f32 %v1083_v44, %v1082_v28  ;;  %v1169_v63 = vmax.f32 %v1137_v2, 0.0  ;;  %v1198_v35 = vld [vmem:[%s3189_s4 + $0x80] sm:$0xff]  ;;  %v1199_v44 = vld [vmem:[%s3189_s4 + $0x88] sm:$0xff] }
 0x1d8   : > { %v1116_v31 = vadd.f32 %v1115_v43, %v1114_v20  ;;  %v2859_v26 = vmul.f32 0.5, %v1095_v24  ;;  %v1065_v5 = vadd.f32 %v1064_v52, %v1063_v34  ;;  %v2861_v46 = vmul.f32 0.5, %v1102_v32 }
 0x1d9   : > { %v1071_v8 = vrot.slane %v1070_v57, 2  ;;  %v1078_v13 = vrot.slane %v1077_v58, 2  ;;  %v1085_v59 = vrot.slane %v1084_v61, 2  ;;  %v2863_v15 = vmul.f32 0.5, %v1109_v42 }
 0x1da   : > { %v2865_v3 = vmul.f32 0.5, %v1116_v31  ;;  %v1066_v54 = vrot.slane %v1065_v5, 1  ;;  %v1237_v9 = vsel %vm1236_vm11, %v1152_v45, %v2788_v21  ;;  %v1249_v0 = vsel %vm1236_vm11, %v1160_v50, %v2809_v37  ;;  %v1201_v31 = vld [vmem:[%s3189_s4 + $0x98] sm:$0xff] }
 0x1db   : > { %v1072_v49 = vadd.f32 %v1071_v8, %v1070_v57  ;;  %v1079_v2 = vadd.f32 %v1078_v13, %v1077_v58  ;;  %v1086_v11 = vadd.f32 %v1085_v59, %v1084_v61  ;;  %v1239_v10 = vsel %vm1238_vm12, %v1153_v18, %v1237_v9 }
 0x1dc   : > { %v1067_v51 = vadd.f32 %v1066_v54, %v1065_v5  ;;  %v1241_v60 = vsel %vm1240_vm13, %v1154_v29, %v1239_v10  ;;  %v1257_v33 = vsel %vm1238_vm12, %v1169_v63, %v1256_v7  ;;  %v1250_v16 = vsel %vm1238_vm12, %v1161_v47, %v1249_v0  ;;  %v1200_v63 = vld [vmem:[%s3189_s4 + $0x90] sm:$0xff] }
 0x1dd   : > { %v1073_v45 = vrot.slane %v1072_v49, 1  ;;  %v1080_v21 = vrot.slane %v1079_v2, 1  ;;  %v1087_v4 = vrot.slane %v1086_v11, 1  ;;  %v1243_v41 = vsel %vm1242_vm14, %v1155_v36, %v1241_v60 }
 0x1de   : > { %v1142_v18 = vmul.f32 0.5, %v1067_v51  ;;  %v2889_v29 = vsel %vm1273_vm15, 0.0, %v1243_v41  ;;  %v1258_v30 = vsel %vm1240_vm13, %v1170_v1, %v1257_v33  ;;  %v1251_v19 = vsel %vm1240_vm13, %v1162_v12, %v1250_v16 }
 0x1df   : > { %v1074_v37 = vadd.f32 %v1073_v45, %v1072_v49  ;;  %v1081_v50 = vadd.f32 %v1080_v21, %v1079_v2  ;;  %v1088_v7 = vadd.f32 %v1087_v4, %v1086_v11  ;;  %v2900_v23 = vsel %vm1242_vm14, %v1163_v14, %v1251_v19 }
 0x1e0   : > { %v1174_v36 = vmax.f32 %v1142_v18, 0.0  ;;  %v1342_v47 = vrot.slane %v2889_v29, 4  ;;  %v2904_v22 = vsel %vm1242_vm14, %v1171_v38, %v1258_v30  ;;  %v1343_v48 = vrot.slane %v2900_v23, 4 }
 0x1e1   : > { %v1143_v17 = vmul.f32 0.5, %v1074_v37  ;;  %v1144_v1 = vmul.f32 0.5, %v1081_v50  ;;  %v1145_v25 = vmul.f32 0.5, %v1088_v7  ;;  %v1299_v12 = vrot.slane %v2889_v29, 2 }
 0x1e2   : > { %v1261_v62 = vsel %vm1246_vm10, %v1174_v36, %v1260_v56  ;;  %v1300_v27 = vrot.slane %v2900_v23, 2  ;;  %v1302_v6 = vrot.slane %v2904_v22, 2  ;;  %v1344_v39 = vsel %vm577_vm3, %v1342_v47, %v1343_v48 }
 0x1e3   : > { %v1175_v14 = vmax.f32 %v1143_v17, 0.0  ;;  %v1176_v28 = vmax.f32 %v1144_v1, 0.0  ;;  %v1177_v24 = vmax.f32 %v1145_v25, 0.0  ;;  %2164 = vmatprep.mubr.msk.f32.mxu1 %vm1351_vm4, %v1344_v39  ;;  %v1278_v32 = vrot.slane %v2889_v29, 1 }
 0x1e4   : > { %v1301_v20 = vsel %vm492_vm1, %v1299_v12, %v1300_v27  ;;  %v1303_v34 = vsel %vm492_vm1, %v1300_v27, %v1302_v6  ;;  %v1279_v53 = vrot.slane %v2900_v23, 1  ;;  %v1178_v38 = vmax.f32 %v2859_v26, 0.0 }
 0x1e5   : > { %v1262_v42 = vsel %vm1234_vm9, %v1175_v14, %v1261_v62  ;;  %v2320_v43 = vpack.i.bf16 %v1303_v34, %v1301_v20  ;;  %v1281_v52 = vrot.slane %v2904_v22, 1  ;;  %v1179_v56 = vmax.f32 %v2861_v46, 0.0 }
 0x1e6   : > { %v1263_v57 = vsel %vm1236_vm11, %v1176_v28, %v1262_v42  ;;  %v1280_v58 = vsel %vm450_vm2, %v1278_v32, %v1279_v53  ;;  %v1324_v61 = vrot.slane %v2904_v22, 3  ;;  %v1322_v5 = vrot.slane %v2900_v23, 3 }
 0x1e7   : > { %2321 = vrot.lane.b32.xlu1 %v2320_v43, %s2377_s27  ;;  %v1282_v26 = vsel %vm450_vm2, %v1279_v53, %v1281_v52  ;;  %v1264_v46 = vsel %vm1238_vm12, %v1177_v24, %v1263_v57  ;;  %v2246_v8 = vpack.c.bf16 %v1199_v44, %v1198_v35  ;;  %v1181_v54 = vmax.f32 %v2865_v3, 0.0 }
 0x1e8   : > { %v2315_v13 = vpack.i.bf16 %v1282_v26, %v1280_v58  ;;  %v1265_v59 = vsel %vm1240_vm13, %v1178_v38, %v1264_v46  ;;  %v1321_v9 = vrot.slane %v2889_v29, 3  ;;  %v1325_v49 = vsel %vm1320_vm5, %v1322_v5, %v1324_v61  ;;  %v1746_v26 = vld [vmem:[#allocation2 + $0x8] sm:$0xff] }
 0x1e9   : > { %v2947_v2 = vsel %vm1242_vm14, %v1179_v56, %v1265_v59  ;;  %2247 = vmatpush1.bf16.msra.mxu1 %v2246_v8  ;;  %v2249_v11 = vpack.c.bf16 %v1201_v31, %v1200_v63  ;;  %v1180_v10 = vmax.f32 %v2863_v15, 0.0  ;;  %vm1361_vm7 = vcmask 785408   ;;  %v1745_v31 = vld [vmem:[#allocation2] sm:$0xff]  ;;  %v1748_v8 = vld [vmem:[#allocation2 + $0x18] sm:$0xff] }
 0x1ea   : > { %2316 = vrot.lane.b32.xlu0 %v2315_v13, %s2378_s28  ;;  %v1283_v51 = vrot.slane %v2947_v2, 1  ;;  %2248 = vmatprep.subr.bf16.mxu1 %v2376_v40  ;;  %v1323_v60 = vsel %vm1320_vm5, %v1321_v9, %v1322_v5  ;;  %v1326_v33 = vrot.slane %v2947_v2, 3  ;;  %v1304_v21 = vrot.slane %v2947_v2, 2  ;;  %v1747_v5 = vld [vmem:[#allocation2 + $0x10] sm:$0xff]  ;;  %v1749_v59 = vld [vmem:[#allocation2 + $0x20] sm:$0xff] }
 0x1eb   : > { %v2325_v3 = vpack.i.bf16 %v1325_v49, %v1323_v60  ;;  %v1267_v45 = vsel %vm1244_vm8, %v1181_v54, %v1180_v10  ;;  %v1345_v27 = vrot.slane %v2904_v22, 4  ;;  %v1347_v53 = vrot.slane %v2947_v2, 4  ;;  %v1750_v54 = vld [vmem:[#allocation2 + $0x28] sm:$0xff]  ;;  %v1751_v49 = vld [vmem:[#allocation2 + $0x30] sm:$0xff]  ;;  %v1753_v10 = vld [vmem:[#allocation2 + $0x40] sm:$0xff] }
 0x1ec   : > { %v1284_v0 = vsel %vm450_vm2, %v1281_v52, %v1283_v51  ;;  %v1275_v15 = vsel %vm1273_vm15, %v1267_v45, 0.0  ;;  %v1327_v4 = vsel %vm1320_vm5, %v1324_v61, %v1326_v33  ;;  %v1305_v41 = vsel %vm492_vm1, %v1302_v6, %v1304_v21  ;;  %v1757_v45 = vld [vmem:[#allocation2 + $0x60] sm:$0xff] }
 0x1ed   : > { %1291 = vrot.lane.b32.xlu1 %v1284_v0, %s2378_s28  ;;  %2250 = vmatpush1.bf16.msra.mxu1 %v2249_v11  ;;  %v1306_v18 = vrot.slane %v1275_v15, 2  ;;  %v1285_v16 = vrot.slane %v1275_v15, 1  ;;  %v1328_v50 = vrot.slane %v1275_v15, 3  ;;  %v1348_v52 = vsel %vm577_vm3, %v1345_v27, %v1347_v53  ;;  %v1756_v0 = vld [vmem:[#allocation2 + $0x58] sm:$0xff] }
 0x1ee   : > { %2326 = vrot.lane.b32.xlu0 %v2325_v3, %s2379_s29  ;;  %v1349_v56 = vrot.slane %v1275_v15, 4  ;;  %v2252_v46 = vpack.c.bf16 %v1746_v26, %v1745_v31  ;;  %v2255_v13 = vpack.c.bf16 %v1748_v8, %v1747_v5  ;;  %v2258_v9 = vpack.c.bf16 %v1750_v54, %v1749_v59  ;;  %v1755_v3 = vld [vmem:[#allocation2 + $0x50] sm:$0xff] }
 0x1ef   : > { %v1307_v30 = vsel %vm492_vm1, %v1304_v21, %v1306_v18  ;;  %v1286_v37 = vsel %vm450_vm2, %v1283_v51, %v1285_v16  ;;  %v1329_v7 = vsel %vm1320_vm5, %v1326_v33, %v1328_v50  ;;  %v1754_v51 = vld [vmem:[#allocation2 + $0x48] sm:$0xff]  ;;  %v2267_v33 = vpack.c.bf16 %v1756_v0, %v1755_v3  ;;  %v1761_v16 = vld [vmem:[#allocation2 + $0x80] sm:$0xff]  ;;  %v1763_v50 = vld [vmem:[#allocation2 + $0x90] sm:$0xff] }
 0x1f0   : > { %v1350_v61 = vsel %vm577_vm3, %v1347_v53, %v1349_v56  ;;  %2253 = vmatpush1.bf16.msra.mxu0 %v2252_v46  ;;  %v2264_v60 = vpack.c.bf16 %v1754_v51, %v1753_v10  ;;  %v1758_v21 = vld [vmem:[#allocation2 + $0x68] sm:$0xff]  ;;  %v3021_v0 = vld [vmem:[%s3190_s5] ss:$0 sm:$0xff] }
 0x1f1   : > { %1334 = vrot.lane.b32.xlu1 %v1327_v4, %s2379_s29  ;;  %2254 = vmatprep.subr.bf16.mxu0 %v2376_v40  ;;  %v2270_v15 = vpack.c.bf16 %v1758_v21, %v1757_v45  ;;  %v1759_v4 = vld [vmem:[#allocation2 + $0x70] sm:$0xff] }
 0x1f2   : > { %1312 = vrot.lane.b32.xlu0 %v1305_v41, %s2377_s27  ;;  %v1760_v41 = vld [vmem:[#allocation2 + $0x78] sm:$0xff] }
 0x1f3   : > { %v2273_v18 = vpack.c.bf16 %v1760_v41, %v1759_v4 }
 0x1f4   : > { %2256 = vmatpush1.bf16.msra.mxu0 %v2255_v13 }
 0x1f5   : > { %1314 = vrot.lane.b32.xlu1 %v1307_v30, %s2377_s27  ;;  %2257 = vmatprep.subr.bf16.mxu0 %v2376_v40  ;;  %v1762_v30 = vld [vmem:[#allocation2 + $0x88] sm:$0xff] }
 0x1f6   : > { %1293 = vrot.lane.b32.xlu0 %v1286_v37, %s2378_s28  ;;  %v2276_v37 = vpack.c.bf16 %v1762_v30, %v1761_v16 }
 0x1f8   : > { %2259 = vmatpush1.bf16.msra.mxu0 %v2258_v9 }
 0x1f9   : > { %2260 = vmatprep.subr.bf16.mxu0 %v2376_v40 }
 0x1fa   : > { %1336 = vrot.lane.b32.xlu0 %v1329_v7, %s2379_s29  ;;  %v1764_v7 = vld [vmem:[#allocation2 + $0x98] sm:$0xff] }
 0x259   : > { %v2322_v19 = vpop.permute.xlu1 %2321 }
 0x25a   : > { %v2323_v17 = vunpack.i.l.bf16 %v2322_v19  ;;  %v2324_v14 = vunpack.i.h.bf16 %v2322_v19  ;;  %v2279_v19 = vpack.c.bf16 %v1764_v7, %v1763_v50 }
 0x25c   : > { %v2317_v36 = vpop.permute.xlu0 %2316 }
 0x25d   : > { %v2318_v47 = vunpack.i.l.bf16 %v2317_v36  ;;  %v2319_v1 = vunpack.i.h.bf16 %v2317_v36  ;;  %v1765_v36 = vld [vmem:[#allocation2 + $0xa0] sm:$0xff] }
 0x25f   : > { %v1292_v25 = vpop.permute.xlu1 %1291  ;;  %v1352_v62 = vsel %vm1351_vm4, %v2889_v29, %v2318_v47  ;;  %v1353_v34 = vsel %vm1351_vm4, %v2900_v23, %v2319_v1  ;;  %v1346_v29 = vsel %vm577_vm3, %v1343_v48, %v1345_v27  ;;  %v1766_v47 = vld [vmem:[#allocation2 + $0xa8] sm:$0xff]  ;;  %v1767_v1 = vld [vmem:[#allocation2 + $0xb0] sm:$0xff]  ;;  %vm1547_vm3 = vcmask 517120  }
 0x260   : > { %v2327_v12 = vpop.permute.xlu0 %2326  ;;  %v1357_v28 = vsel %vm1356_vm6, %v1352_v62, %v2323_v17  ;;  %v1354_v35 = vsel %vm1351_vm4, %v2904_v22, %v1292_v25  ;;  %v1358_v44 = vsel %vm1356_vm6, %v1353_v34, %v2324_v14  ;;  %v2282_v17 = vpack.c.bf16 %v1766_v47, %v1765_v36  ;;  %v1768_v25 = vld [vmem:[#allocation2 + $0xb8] sm:$0xff] }
 0x261   : > { %v2328_v6 = vunpack.i.l.bf16 %v2327_v12  ;;  %v2329_v24 = vunpack.i.h.bf16 %v2327_v12  ;;  %v2285_v62 = vpack.c.bf16 %v1768_v25, %v1767_v1  ;;  %v3027_v25 = vld [vmem:[%s3191_s6] ss:$0 sm:$0xff] }
 0x263   : > { %v1362_v39 = vsel %vm1361_vm7, %v1357_v28, %v2328_v6  ;;  %v1335_v20 = vpop.permute.xlu1 %1334  ;;  %v1363_v38 = vsel %vm1361_vm7, %v1358_v44, %v2329_v24 }
 0x264   : > { %v1313_v32 = vpop.permute.xlu0 %1312  ;;  %1439 = vmatmul.mubr.f32.vlgmr.msra.gmra.mrb[0].mxu1 %v1362_v39 }
 0x265   : > { %2165 = vmatprep.mubr.msk.f32.mxu1 %vm1351_vm4, %v1346_v29  ;;  %v1359_v42 = vsel %vm1356_vm6, %v1354_v35, %v1313_v32 }
 0x266   : > { %v1364_v22 = vsel %vm1361_vm7, %v1359_v42, %v1335_v20 }
 0x267   : > { %v1315_v48 = vpop.permute.xlu1 %1314 }
 0x268   : > { %v1294_v43 = vpop.permute.xlu0 %1293  ;;  %1444 = vmatmul.mubr.f32.gmra.mrb[2].mxu1 %v1363_v38 }
 0x269   : > { %v1355_v23 = vsel %vm1351_vm4, %v2947_v2, %v1294_v43  ;;  %2166 = vmatprep.mubr.msk.f32.mxu1 %vm1351_vm4, %v1348_v52  ;;  %v1752_v2 = vld [vmem:[#allocation2 + $0x38] sm:$0xff] }
 0x26a   : > { %v1360_v57 = vsel %vm1356_vm6, %v1355_v23, %v1315_v48  ;;  %v2261_v11 = vpack.c.bf16 %v1752_v2, %v1751_v49 }
 0x26c   : > { %v1337_v58 = vpop.permute.xlu0 %1336  ;;  %1449 = vmatmul.mubr.f32.gmra.mrb[4].mxu1 %v1364_v22  ;;  %2262 = vmatpush1.bf16.msra.mxu0 %v2261_v11 }
 0x26d   : > { %2167 = vmatprep.mubr.msk.f32.mxu1 %vm1351_vm4, %v1350_v61  ;;  %v1365_v63 = vsel %vm1361_vm7, %v1360_v57, %v1337_v58  ;;  %2263 = vmatprep.subr.bf16.mxu0 %v2376_v40 }
 0x270   : > { %1454 = vmatmul.mubr.f32.gmra.mrb[6].mxu1 %v1365_v63  ;;  %2265 = vmatpush1.bf16.msra.mxu0 %v2264_v60 }
 0x271   : > { %2266 = vmatprep.subr.bf16.mxu0 %v2376_v40 }
 0x274   : > { %2268 = vmatpush1.bf16.msra.mxu0 %v2267_v33 }
 0x275   : > { %2269 = vmatprep.subr.bf16.mxu0 %v2376_v40 }
 0x278   : > { %2271 = vmatpush1.bf16.msra.mxu0 %v2270_v15 }
 0x279   : > { %2272 = vmatprep.subr.bf16.mxu0 %v2376_v40 }
 0x27c   : > { %2274 = vmatpush1.bf16.msra.mxu0 %v2273_v18 }
 0x27d   : > { %2275 = vmatprep.subr.bf16.mxu0 %v2376_v40 }
 0x280   : > { %2277 = vmatpush1.bf16.msra.mxu0 %v2276_v37 }
 0x281   : > { %2278 = vmatprep.subr.bf16.mxu0 %v2376_v40 }
 0x284   : > { %2280 = vmatpush1.bf16.msra.mxu0 %v2279_v19 }
 0x285   : > { %2281 = vmatprep.subr.bf16.mxu0 %v2376_v40 }
 0x288   : > { %2283 = vmatpush1.bf16.msra.mxu0 %v2282_v17 }
 0x289   : > { %2284 = vmatprep.subr.bf16.mxu0 %v2376_v40 }
 0x28c   : > { %2286 = vmatpush1.bf16.msra.mxu0 %v2285_v62 }
 0x337   : > { %v1440_v12 = vpop.f32.mrb[0].mxu1 }
 0x338   : > { %v1463_v27 = vcombine.high %v1440_v12, %v1440_v12  ;;  %v1470_v6 = vrot.slane %v1440_v12, %v2659_v55  ;;  %v1442_v14 = vpop.f32.mrb[1].mxu1 }
 0x33a   : > { %v1477_v28 = vrot.slane %v1463_v27, %v2659_v55  ;;  %v1478_v24 = vcombine.high %v1470_v6, %v1470_v6  ;;  %v1548_v39 = vsel %vm1547_vm3, %v1470_v6, -inf }
 0x33b   : > { %v1549_v20 = vrot.slane %v1548_v39, 4  ;;  %v1445_v34 = vpop.f32.mrb[2].mxu1 }
 0x33c   : > { %v1479_v32 = vcombine.high %v1477_v28, %v1477_v28  ;;  %v1555_v29 = vsel %vm1547_vm3, %v1478_v24, -inf  ;;  %v1562_v53 = vsel %vm1547_vm3, %v1477_v28, -inf  ;;  %v1480_v40 = vcombine.high %v1445_v34, %v1445_v34  ;;  %v1447_v35 = vpop.f32.mrb[3].mxu1 }
 0x33d   : > { %v1550_v44 = vmax.f32 %v1548_v39, %v1549_v20  ;;  %v1556_v38 = vrot.slane %v1555_v29, 4  ;;  %v1563_v42 = vrot.slane %v1562_v53, 4  ;;  %v1487_v43 = vrot.slane %v1445_v34, %v2659_v55  ;;  %v3034_v20 = vld [vmem:[%s3192_s7] ss:$0 sm:$0xff] }
 0x33e   : > { %v1569_v52 = vsel %vm1547_vm3, %v1479_v32, -inf  ;;  %v1494_v23 = vrot.slane %v1480_v40, %v2659_v55 }
 0x33f   : > { %v1551_v48 = vrot.slane %v1550_v44, 2  ;;  %v1557_v56 = vmax.f32 %v1555_v29, %v1556_v38  ;;  %v1564_v22 = vmax.f32 %v1562_v53, %v1563_v42  ;;  %v1570_v57 = vrot.slane %v1569_v52, 4  ;;  %v3010_v58 = vpop.f32.mrb[4].mxu1 }
 0x340   : > { %v1495_v61 = vcombine.high %v1487_v43, %v1487_v43  ;;  %v1496_v63 = vcombine.high %v1494_v23, %v1494_v23  ;;  %v1576_v31 = vsel %vm1547_vm3, %v1487_v43, -inf  ;;  %v1590_v26 = vsel %vm1547_vm3, %v1494_v23, -inf  ;;  %v1452_v5 = vpop.f32.mrb[5].mxu1 }
 0x341   : > { %v1552_v46 = vmax.f32 %v1550_v44, %v1551_v48  ;;  %v1558_v8 = vrot.slane %v1557_v56, 2  ;;  %v1565_v13 = vrot.slane %v1564_v22, 2  ;;  %v1571_v59 = vmax.f32 %v1569_v52, %v1570_v57 }
 0x342   : > { %v1577_v54 = vrot.slane %v1576_v31, 4  ;;  %v1583_v9 = vsel %vm1547_vm3, %v1495_v61, -inf  ;;  %v1591_v49 = vrot.slane %v1590_v26, 4  ;;  %v1597_v2 = vsel %vm1547_vm3, %v1496_v63, -inf }
 0x343   : > { %v1553_v11 = vrot.slane %v1552_v46, 1  ;;  %v1559_v10 = vmax.f32 %v1557_v56, %v1558_v8  ;;  %v1566_v51 = vmax.f32 %v1564_v22, %v1565_v13  ;;  %v1572_v60 = vrot.slane %v1571_v59, 2  ;;  %v3016_v3 = vpop.f32.mrb[6].mxu1 }
 0x344   : > { %v1578_v33 = vmax.f32 %v1576_v31, %v1577_v54  ;;  %v1584_v45 = vrot.slane %v1583_v9, 4  ;;  %v1592_v21 = vmax.f32 %v1590_v26, %v1591_v49  ;;  %v1598_v15 = vrot.slane %v1597_v2, 4  ;;  %v1457_v4 = vpop.f32.mrb[7].mxu1 }
 0x345   : > { %v1554_v41 = vmax.f32 %v1552_v46, %v1553_v11  ;;  %v1560_v18 = vrot.slane %v1559_v10, 1  ;;  %v1567_v16 = vrot.slane %v1566_v51, 1  ;;  %v1573_v30 = vmax.f32 %v1571_v59, %v1572_v60 }
 0x346   : > { %v1579_v37 = vrot.slane %v1578_v33, 2  ;;  %v1585_v50 = vmax.f32 %v1583_v9, %v1584_v45  ;;  %v1593_v7 = vrot.slane %v1592_v21, 2  ;;  %v1599_v19 = vmax.f32 %v1597_v2, %v1598_v15 }
 0x347   : > { %v1561_v36 = vmax.f32 %v1559_v10, %v1560_v18  ;;  %v1568_v47 = vmax.f32 %v1566_v51, %v1567_v16  ;;  %v1574_v17 = vrot.slane %v1573_v30, 1  ;;  %v1667_v1 = vadd.f32 %v3021_v0, %v1554_v41 }
 0x348   : > { %v1580_v62 = vmax.f32 %v1578_v33, %v1579_v37  ;;  %v1586_v12 = vrot.slane %v1585_v50, 2  ;;  %v1594_v27 = vmax.f32 %v1592_v21, %v1593_v7  ;;  %v1600_v6 = vrot.slane %v1599_v19, 2 }
 0x349   : > { %v1575_v14 = vmax.f32 %v1573_v30, %v1574_v17  ;;  %v1668_v28 = vadd.f32 %v3021_v0, %v1561_v36  ;;  %v1669_v24 = vadd.f32 %v3021_v0, %v1568_v47  ;;  %v1683_v39 = vmax.f32 %v1667_v1, 0.0 }
 0x34a   : > { %v1581_v34 = vrot.slane %v1580_v62, 1  ;;  %v1587_v32 = vmax.f32 %v1585_v50, %v1586_v12  ;;  %v1595_v29 = vrot.slane %v1594_v27, 1  ;;  %v1601_v53 = vmax.f32 %v1599_v19, %v1600_v6 }
 0x34b   : > { %v1670_v40 = vadd.f32 %v3021_v0, %v1575_v14  ;;  %v1684_v35 = vmax.f32 %v1668_v28, 0.0  ;;  %v1685_v44 = vmax.f32 %v1669_v24, 0.0  ;;  %v1706_v38 = vmul.f32 %v3027_v25, %v1683_v39 }
 0x34c   : > { %v1582_v42 = vmax.f32 %v1580_v62, %v1581_v34  ;;  %v1588_v43 = vrot.slane %v1587_v32, 1  ;;  %v1596_v52 = vmax.f32 %v1594_v27, %v1595_v29  ;;  %v1602_v23 = vrot.slane %v1601_v53, 1 }
 0x34d   : > { %v1686_v48 = vmax.f32 %v1670_v40, 0.0  ;;  %v1707_v56 = vmul.f32 %v3027_v25, %v1684_v35  ;;  %v1708_v22 = vmul.f32 %v3027_v25, %v1685_v44  ;;  %v1729_v57 = vadd.f32 %v3034_v20, %v1706_v38 }
 0x34e   : > { %v1589_v61 = vmax.f32 %v1587_v32, %v1588_v43  ;;  %v1603_v63 = vmax.f32 %v1601_v53, %v1602_v23  ;;  %v1671_v31 = vadd.f32 %v3021_v0, %v1582_v42  ;;  %v1673_v26 = vadd.f32 %v3021_v0, %v1596_v52 }
 0x34f   : > { %v1709_v5 = vmul.f32 %v3027_v25, %v1686_v48  ;;  %v1730_v46 = vadd.f32 %v3034_v20, %v1707_v56  ;;  %v3046_v8 = vadd.f32 %v3034_v20, %v1708_v22  ;;  %v1785_v13 = vrot.slane %v1729_v57, 7 }
 0x350   : > { %v1672_v59 = vadd.f32 %v3021_v0, %v1589_v61  ;;  %v1674_v54 = vadd.f32 %v3021_v0, %v1603_v63  ;;  %v1687_v9 = vmax.f32 %v1671_v31, 0.0  ;;  %v1689_v49 = vmax.f32 %v1673_v26, 0.0 }
 0x351   : > { %v3051_v2 = vadd.f32 %v3034_v20, %v1709_v5  ;;  %v1786_v11 = vrot.slane %v1730_v46, 6  ;;  %v1788_v10 = vrot.slane %v3046_v8, 5  ;;  %v1497_v51 = vcombine.high %v3010_v58, %v3010_v58 }
 0x352   : > { %v1688_v60 = vmax.f32 %v1672_v59, 0.0  ;;  %v1690_v33 = vmax.f32 %v1674_v54, 0.0  ;;  %v1710_v45 = vmul.f32 %v3027_v25, %v1687_v9  ;;  %v3058_v21 = vmul.f32 %v3027_v25, %v1689_v49 }
 0x353   : > { %v3061_v15 = vsel %vm1246_vm10, %v1786_v11, %v1785_v13  ;;  %v1790_v4 = vrot.slane %v3051_v2, 4  ;;  %v1504_v41 = vrot.slane %v3010_v58, %v2659_v55  ;;  %v1511_v18 = vrot.slane %v1497_v51, %v2659_v55 }
 0x354   : > { %v1711_v16 = vmul.f32 %v3027_v25, %v1688_v60  ;;  %v1713_v30 = vmul.f32 %v3027_v25, %v1690_v33  ;;  %v3070_v37 = vadd.f32 %v3034_v20, %v1710_v45  ;;  %v1514_v50 = vcombine.high %v3016_v3, %v3016_v3 }
 0x355   : > { %v1512_v7 = vcombine.high %v1504_v41, %v1504_v41  ;;  %v1513_v19 = vcombine.high %v1511_v18, %v1511_v18  ;;  %v1604_v36 = vsel %vm1547_vm3, %v1504_v41, -inf  ;;  %v1618_v47 = vsel %vm1547_vm3, %v1511_v18, -inf }
 0x356   : > { %v3077_v58 = vadd.f32 %v3034_v20, %v1711_v16  ;;  %v3080_v17 = vadd.f32 %v3034_v20, %v1713_v30  ;;  %v1792_v1 = vrot.slane %v3070_v37, 3  ;;  %v1605_v62 = vrot.slane %v1604_v36, 4 }
 0x357   : > { %v1611_v12 = vsel %vm1547_vm3, %v1512_v7, -inf  ;;  %v1619_v27 = vrot.slane %v1618_v47, 4  ;;  %v1625_v6 = vsel %vm1547_vm3, %v1513_v19, -inf  ;;  %v1521_v14 = vrot.slane %v3016_v3, %v2659_v55 }
 0x358   : > { %v1794_v28 = vrot.slane %v3077_v58, 2  ;;  %v1606_v24 = vmax.f32 %v1604_v36, %v1605_v62  ;;  %v1612_v39 = vrot.slane %v1611_v12, 4  ;;  %v1626_v34 = vrot.slane %v1625_v6, 4 }
 0x359   : > { %v1620_v32 = vmax.f32 %v1618_v47, %v1619_v27  ;;  %v1528_v29 = vrot.slane %v1514_v50, %v2659_v55  ;;  %v1529_v53 = vcombine.high %v1521_v14, %v1521_v14  ;;  %v1632_v40 = vsel %vm1547_vm3, %v1521_v14, -inf }
 0x35a   : > { %v1607_v35 = vrot.slane %v1606_v24, 2  ;;  %v1613_v44 = vmax.f32 %v1611_v12, %v1612_v39  ;;  %v1627_v38 = vmax.f32 %v1625_v6, %v1626_v34  ;;  %v1633_v42 = vrot.slane %v1632_v40, 4 }
 0x35b   : > { %v1621_v43 = vrot.slane %v1620_v32, 2  ;;  %v1530_v52 = vcombine.high %v1528_v29, %v1528_v29  ;;  %v1639_v23 = vsel %vm1547_vm3, %v1529_v53, -inf  ;;  %v1646_v3 = vsel %vm1547_vm3, %v1528_v29, -inf }
 0x35c   : > { %v1608_v48 = vmax.f32 %v1606_v24, %v1607_v35  ;;  %v1614_v56 = vrot.slane %v1613_v44, 2  ;;  %v1628_v22 = vrot.slane %v1627_v38, 2  ;;  %v1634_v57 = vmax.f32 %v1632_v40, %v1633_v42 }
 0x35d   : > { %v1622_v61 = vmax.f32 %v1620_v32, %v1621_v43  ;;  %v1640_v63 = vrot.slane %v1639_v23, 4  ;;  %v1647_v31 = vrot.slane %v1646_v3, 4  ;;  %v1653_v26 = vsel %vm1547_vm3, %v1530_v52, -inf }
 0x35e   : > { %v1609_v5 = vrot.slane %v1608_v48, 1  ;;  %v1615_v46 = vmax.f32 %v1613_v44, %v1614_v56  ;;  %v1629_v13 = vmax.f32 %v1627_v38, %v1628_v22  ;;  %v1635_v59 = vrot.slane %v1634_v57, 2 }
 0x35f   : > { %v1623_v54 = vrot.slane %v1622_v61, 1  ;;  %v1641_v9 = vmax.f32 %v1639_v23, %v1640_v63  ;;  %v1648_v49 = vmax.f32 %v1646_v3, %v1647_v31  ;;  %v1654_v11 = vrot.slane %v1653_v26, 4 }
 0x360   : > { %v1610_v51 = vmax.f32 %v1608_v48, %v1609_v5  ;;  %v1616_v60 = vrot.slane %v1615_v46, 1  ;;  %v1630_v33 = vrot.slane %v1629_v13, 1  ;;  %v1636_v45 = vmax.f32 %v1634_v57, %v1635_v59 }
 0x361   : > { %v1624_v41 = vmax.f32 %v1622_v61, %v1623_v54  ;;  %v1642_v18 = vrot.slane %v1641_v9, 2  ;;  %v1649_v16 = vrot.slane %v1648_v49, 2  ;;  %v1655_v30 = vmax.f32 %v1653_v26, %v1654_v11 }
 0x362   : > { %v1617_v50 = vmax.f32 %v1615_v46, %v1616_v60  ;;  %v1631_v7 = vmax.f32 %v1629_v13, %v1630_v33  ;;  %v1675_v19 = vadd.f32 %v3021_v0, %v1610_v51  ;;  %v1637_v36 = vrot.slane %v1636_v45, 1 }
 0x363   : > { %v1677_v47 = vadd.f32 %v3021_v0, %v1624_v41  ;;  %v1643_v62 = vmax.f32 %v1641_v9, %v1642_v18  ;;  %v1650_v12 = vmax.f32 %v1648_v49, %v1649_v16  ;;  %v1656_v27 = vrot.slane %v1655_v30, 2 }
 0x364   : > { %v1676_v6 = vadd.f32 %v3021_v0, %v1617_v50  ;;  %v1678_v14 = vadd.f32 %v3021_v0, %v1631_v7  ;;  %v1691_v24 = vmax.f32 %v1675_v19, 0.0  ;;  %v1638_v39 = vmax.f32 %v1636_v45, %v1637_v36 }
 0x365   : > { %v1693_v34 = vmax.f32 %v1677_v47, 0.0  ;;  %v1644_v32 = vrot.slane %v1643_v62, 1  ;;  %v1651_v29 = vrot.slane %v1650_v12, 1  ;;  %v1657_v53 = vmax.f32 %v1655_v30, %v1656_v27 }
 0x366   : > { %v1692_v40 = vmax.f32 %v1676_v6, 0.0  ;;  %v1694_v35 = vmax.f32 %v1678_v14, 0.0  ;;  %v1714_v44 = vmul.f32 %v3027_v25, %v1691_v24  ;;  %v1679_v38 = vadd.f32 %v3021_v0, %v1638_v39 }
 0x367   : > { %v1716_v42 = vmul.f32 %v3027_v25, %v1693_v34  ;;  %v1645_v43 = vmax.f32 %v1643_v62, %v1644_v32  ;;  %v1652_v52 = vmax.f32 %v1650_v12, %v1651_v29  ;;  %v1658_v23 = vrot.slane %v1657_v53, 1 }
 0x368   : > { %v1715_v3 = vmul.f32 %v3027_v25, %v1692_v40  ;;  %v1717_v48 = vmul.f32 %v3027_v25, %v1694_v35  ;;  %v1737_v56 = vadd.f32 %v3034_v20, %v1714_v44  ;;  %v1695_v22 = vmax.f32 %v1679_v38, 0.0 }
 0x369   : > { %v1739_v57 = vadd.f32 %v3034_v20, %v1716_v42  ;;  %v1659_v61 = vmax.f32 %v1657_v53, %v1658_v23  ;;  %v1680_v63 = vadd.f32 %v3021_v0, %v1645_v43  ;;  %v1681_v31 = vadd.f32 %v3021_v0, %v1652_v52 }
 0x36a   : > { %v1738_v26 = vadd.f32 %v3034_v20, %v1715_v3  ;;  %v1740_v5 = vadd.f32 %v3034_v20, %v1717_v48  ;;  %v1798_v46 = vrot.slane %v1737_v56, 7  ;;  %v1718_v13 = vmul.f32 %v3027_v25, %v1695_v22 }
 0x36b   : > { %v1802_v59 = vrot.slane %v1739_v57, 5  ;;  %v1696_v54 = vmax.f32 %v1680_v63, 0.0  ;;  %v1697_v9 = vmax.f32 %v1681_v31, 0.0  ;;  %v1735_v49 = vadd.f32 %v3034_v20, %v3058_v21 }
 0x36c   : > { %v1799_v11 = vsel %vm1244_vm8, %v1798_v46, %v3080_v17  ;;  %v1800_v51 = vrot.slane %v1738_v26, 6  ;;  %v1804_v60 = vrot.slane %v1740_v5, 4  ;;  %v1741_v33 = vadd.f32 %v3034_v20, %v1718_v13 }
 0x36d   : > { %v1719_v45 = vmul.f32 %v3027_v25, %v1696_v54  ;;  %v1720_v41 = vmul.f32 %v3027_v25, %v1697_v9  ;;  %v1789_v18 = vsel %vm1234_vm9, %v1788_v10, %v3061_v15  ;;  %v1796_v16 = vrot.slane %v1735_v49, 1 }
 0x36e   : > { %v1806_v30 = vrot.slane %v1741_v33, 3  ;;  %v1791_v21 = vsel %vm1236_vm11, %v1790_v4, %v1789_v18  ;;  %v1801_v17 = vsel %vm1246_vm10, %v1800_v51, %v1799_v11  ;;  %v1682_v50 = vadd.f32 %v3021_v0, %v1659_v61 }
 0x36f   : > { %v1742_v7 = vadd.f32 %v3034_v20, %v1719_v45  ;;  %v1743_v19 = vadd.f32 %v3034_v20, %v1720_v41  ;;  %v1793_v8 = vsel %vm1238_vm12, %v1792_v1, %v1791_v21  ;;  %v1803_v10 = vsel %vm1234_vm9, %v1802_v59, %v1801_v17 }
 0x370   : > { %v1795_v2 = vsel %vm1240_vm13, %v1794_v28, %v1793_v8  ;;  %v1805_v15 = vsel %vm1236_vm11, %v1804_v60, %v1803_v10  ;;  %v1698_v4 = vmax.f32 %v1682_v50, 0.0 }
 0x371   : > { %v1797_v36 = vsel %vm1242_vm14, %v1796_v16, %v1795_v2  ;;  %v1807_v0 = vsel %vm1238_vm12, %v1806_v30, %v1805_v15  ;;  %v1808_v47 = vrot.slane %v1742_v7, 2  ;;  %v1810_v62 = vrot.slane %v1743_v19, 1 }
 0x372   : > { %v1815_v12 = vsel %vm421_vm0, 0.0, %v1797_v36  ;;  %v1721_v37 = vmul.f32 %v3027_v25, %v1698_v4  ;;  %v2173_v36 = vld [vmem:[%s3194_s9] ss:$0 sm:$0xff] }
 0x373   : > { %v1809_v1 = vsel %vm1240_vm13, %v1808_v47, %v1807_v0  ;;  %v1830_v28 = vrot.slane %v1815_v12, 2  ;;  %v1819_v14 = vrot.slane %v1815_v12, 1 }
 0x374   : > { %v1811_v27 = vsel %vm1242_vm14, %v1810_v62, %v1809_v1  ;;  %v1744_v58 = vadd.f32 %v3034_v20, %v1721_v37 }
 0x375   : > { %v1831_v6 = vrot.slane %v1811_v27, 2  ;;  %v1820_v24 = vrot.slane %v1811_v27, 1 }
 0x376   : > { %v1816_v39 = vsel %vm421_vm0, %v1744_v58, 0.0 }
 0x377   : > { %v1832_v34 = vsel %vm492_vm1, %v1830_v28, %v1831_v6  ;;  %v1821_v32 = vsel %vm450_vm2, %v1819_v14, %v1820_v24  ;;  %v1822_v29 = vrot.slane %v1816_v39, 1  ;;  %v1833_v53 = vrot.slane %v1816_v39, 2 }
 0x378   : > { %2171 = vmatprep.mubr.msk.f32.mxu0 %vm1356_vm6, %v1832_v34  ;;  %1824 = vrot.lane.b32.xlu1 %v1821_v32, %s2377_s27 }
 0x379   : > { %v1823_v25 = vsel %vm450_vm2, %v1820_v24, %v1822_v29  ;;  %v1834_v20 = vsel %vm492_vm1, %v1831_v6, %v1833_v53  ;;  %v2174_v53 = vld [vmem:[%s3195_s10] ss:$0 sm:$0xff] }
 0x37a   : > { %1826 = vrot.lane.b32.xlu0 %v1823_v25, %s2377_s27 }
 0x3ea   : > { %v1825_v40 = vpop.permute.xlu1 %1824 }
 0x3eb   : > { %v1835_v35 = vsel %vm1356_vm6, %v1815_v12, %v1825_v40 }
 0x3ec   : > { %v1827_v44 = vpop.permute.xlu0 %1826  ;;  %1906 = vmatmul.mubr.f32.vlgmr.msra.gmra.mrb[8].mxu0 %v1835_v35 }
 0x3ed   : > { %2172 = vmatprep.mubr.msk.f32.mxu0 %vm1356_vm6, %v1834_v20  ;;  %v1836_v38 = vsel %vm1356_vm6, %v1811_v27, %v1827_v44 }
 0x3f0   : > { %1911 = vmatmul.mubr.f32.gmra.mrb[10].mxu0 %v1836_v38 }
 0x4bf   : > { %v1907_v42 = vpop.f32.mrb[8].mxu0 }
 0x4c0   : > { %v1918_v43 = vcombine.high %v1907_v42, %v1907_v42  ;;  %v1925_v52 = vrot.slane %v1907_v42, %v2659_v55  ;;  %v1909_v23 = vpop.f32.mrb[9].mxu0 }
 0x4c2   : > { %v1932_v3 = vrot.slane %v1918_v43, %v2659_v55  ;;  %v1933_v48 = vcombine.high %v1925_v52, %v1925_v52  ;;  %v1960_v56 = vsel %vm1273_vm15, %v1925_v52, -inf }
 0x4c3   : > { %v1961_v22 = vrot.slane %v1960_v56, 4  ;;  %v1912_v57 = vpop.f32.mrb[10].mxu0 }
 0x4c4   : > { %v1934_v61 = vcombine.high %v1932_v3, %v1932_v3  ;;  %v1967_v63 = vsel %vm1273_vm15, %v1933_v48, -inf  ;;  %v1974_v31 = vsel %vm1273_vm15, %v1932_v3, -inf  ;;  %v1935_v26 = vcombine.high %v1912_v57, %v1912_v57  ;;  %v1914_v5 = vpop.f32.mrb[11].mxu0 }
 0x4c5   : > { %v1962_v46 = vmax.f32 %v1960_v56, %v1961_v22  ;;  %v1968_v13 = vrot.slane %v1967_v63, 4  ;;  %v1975_v59 = vrot.slane %v1974_v31, 4  ;;  %v1942_v54 = vrot.slane %v1912_v57, %v2659_v55 }
 0x4c6   : > { %v1981_v9 = vsel %vm1273_vm15, %v1934_v61, -inf  ;;  %v1949_v49 = vrot.slane %v1935_v26, %v2659_v55 }
 0x4c7   : > { %v1963_v11 = vrot.slane %v1962_v46, 2  ;;  %v1969_v51 = vmax.f32 %v1967_v63, %v1968_v13  ;;  %v1976_v60 = vmax.f32 %v1974_v31, %v1975_v59  ;;  %v1982_v33 = vrot.slane %v1981_v9, 4 }
 0x4c8   : > { %v1950_v45 = vcombine.high %v1942_v54, %v1942_v54  ;;  %v1951_v41 = vcombine.high %v1949_v49, %v1949_v49  ;;  %v1988_v18 = vsel %vm1273_vm15, %v1942_v54, -inf  ;;  %v2002_v16 = vsel %vm1273_vm15, %v1949_v49, -inf }
 0x4c9   : > { %v1964_v30 = vmax.f32 %v1962_v46, %v1963_v11  ;;  %v1970_v21 = vrot.slane %v1969_v51, 2  ;;  %v1977_v17 = vrot.slane %v1976_v60, 2  ;;  %v1983_v50 = vmax.f32 %v1981_v9, %v1982_v33 }
 0x4ca   : > { %v1989_v7 = vrot.slane %v1988_v18, 4  ;;  %v1995_v19 = vsel %vm1273_vm15, %v1950_v45, -inf  ;;  %v2003_v8 = vrot.slane %v2002_v16, 4  ;;  %v2009_v55 = vsel %vm1273_vm15, %v1951_v41, -inf }
 0x4cb   : > { %v1965_v10 = vrot.slane %v1964_v30, 1  ;;  %v1971_v2 = vmax.f32 %v1969_v51, %v1970_v21  ;;  %v1978_v15 = vmax.f32 %v1976_v60, %v1977_v17  ;;  %v1984_v4 = vrot.slane %v1983_v50, 2 }
 0x4cc   : > { %v1990_v0 = vmax.f32 %v1988_v18, %v1989_v7  ;;  %v1996_v47 = vrot.slane %v1995_v19, 4  ;;  %v2004_v62 = vmax.f32 %v2002_v16, %v2003_v8  ;;  %v2010_v12 = vrot.slane %v2009_v55, 4 }
 0x4cd   : > { %v1966_v37 = vmax.f32 %v1964_v30, %v1965_v10  ;;  %v1972_v1 = vrot.slane %v1971_v2, 1  ;;  %v1979_v27 = vrot.slane %v1978_v15, 1  ;;  %v1985_v58 = vmax.f32 %v1983_v50, %v1984_v4 }
 0x4ce   : > { %v1991_v28 = vrot.slane %v1990_v0, 2  ;;  %v1997_v6 = vmax.f32 %v1995_v19, %v1996_v47  ;;  %v2005_v14 = vrot.slane %v2004_v62, 2  ;;  %v2011_v24 = vmax.f32 %v2009_v55, %v2010_v12 }
 0x4cf   : > { %v1973_v39 = vmax.f32 %v1971_v2, %v1972_v1  ;;  %v1980_v34 = vmax.f32 %v1978_v15, %v1979_v27  ;;  %v1986_v32 = vrot.slane %v1985_v58, 1  ;;  %v2023_v29 = vmul.f32 %v2173_v36, %v1966_v37 }
 0x4d0   : > { %v1992_v25 = vmax.f32 %v1990_v0, %v1991_v28  ;;  %v1998_v20 = vrot.slane %v1997_v6, 2  ;;  %v2006_v40 = vmax.f32 %v2004_v62, %v2005_v14  ;;  %v2012_v35 = vrot.slane %v2011_v24, 2 }
 0x4d1   : > { %v1987_v44 = vmax.f32 %v1985_v58, %v1986_v32  ;;  %v2024_v38 = vmul.f32 %v2173_v36, %v1973_v39  ;;  %v2025_v42 = vmul.f32 %v2173_v36, %v1980_v34  ;;  %v2038_v56 = vadd.f32 %v2174_v53, %v2023_v29 }
 0x4d2   : > { %v1993_v43 = vrot.slane %v1992_v25, 1  ;;  %v1999_v52 = vmax.f32 %v1997_v6, %v1998_v20  ;;  %v2007_v23 = vrot.slane %v2006_v40, 1  ;;  %v2013_v3 = vmax.f32 %v2011_v24, %v2012_v35 }
 0x4d3   : > { %v2026_v48 = vmul.f32 %v2173_v36, %v1987_v44  ;;  %v2039_v22 = vadd.f32 %v2174_v53, %v2024_v38  ;;  %v2040_v57 = vadd.f32 %v2174_v53, %v2025_v42  ;;  %v2046_v11 = vmax.f32 %v2038_v56, 0.0 }
 0x4d4   : > { %v1994_v61 = vmax.f32 %v1992_v25, %v1993_v43  ;;  %v2000_v63 = vrot.slane %v1999_v52, 1  ;;  %v2008_v31 = vmax.f32 %v2006_v40, %v2007_v23  ;;  %v2014_v26 = vrot.slane %v2013_v3, 1 }
 0x4d5   : > { %v2041_v5 = vadd.f32 %v2174_v53, %v2026_v48  ;;  %v2047_v46 = vmax.f32 %v2039_v22, 0.0  ;;  %v2048_v13 = vmax.f32 %v2040_v57, 0.0 }
 0x4d6   : > { %v2001_v59 = vmax.f32 %v1999_v52, %v2000_v63  ;;  %v2015_v54 = vmax.f32 %v2013_v3, %v2014_v26  ;;  %v2027_v9 = vmul.f32 %v2173_v36, %v1994_v61  ;;  %v2029_v49 = vmul.f32 %v2173_v36, %v2008_v31 }
 0x4d7   : > { %v2049_v51 = vmax.f32 %v2041_v5, 0.0  ;;  %v2062_v60 = vrot.slane %v2047_v46, 7  ;;  %v2064_v33 = vrot.slane %v2048_v13, 6 }
 0x4d8   : > { %v2028_v45 = vmul.f32 %v2173_v36, %v2001_v59  ;;  %v2030_v41 = vmul.f32 %v2173_v36, %v2015_v54  ;;  %v2042_v18 = vadd.f32 %v2174_v53, %v2027_v9  ;;  %v2044_v16 = vadd.f32 %v2174_v53, %v2029_v49 }
 0x4d9   : > { %v2063_v30 = vsel %vm1244_vm8, %v2062_v60, %v2046_v11  ;;  %v2066_v21 = vrot.slane %v2049_v51, 5 }
 0x4da   : > { %v2065_v17 = vsel %vm1246_vm10, %v2064_v33, %v2063_v30  ;;  %v2043_v50 = vadd.f32 %v2174_v53, %v2028_v45  ;;  %v2045_v7 = vadd.f32 %v2174_v53, %v2030_v41  ;;  %v2050_v19 = vmax.f32 %v2042_v18, 0.0 }
 0x4db   : > { %v2052_v8 = vmax.f32 %v2044_v16, 0.0  ;;  %v2067_v55 = vsel %vm1234_vm9, %v2066_v21, %v2065_v17 }
 0x4dc   : > { %v2051_v10 = vmax.f32 %v2043_v50, 0.0  ;;  %v2053_v2 = vmax.f32 %v2045_v7, 0.0  ;;  %v2068_v15 = vrot.slane %v2050_v19, 4 }
 0x4dd   : > { %v2072_v4 = vrot.slane %v2052_v8, 2 }
 0x4de   : > { %v2069_v36 = vsel %vm1236_vm11, %v2068_v15, %v2067_v55  ;;  %v2070_v0 = vrot.slane %v2051_v10, 3  ;;  %v2074_v47 = vrot.slane %v2053_v2, 1 }
 0x4e0   : > { %v2071_v62 = vsel %vm1238_vm12, %v2070_v0, %v2069_v36 }
 0x4e1   : > { %v2073_v12 = vsel %vm1240_vm13, %v2072_v4, %v2071_v62 }
 0x4e2   : > { %v2075_v37 = vsel %vm1242_vm14, %v2074_v47, %v2073_v12 }
 0x4e3   : > { %2077 = vst [vmem:[%s399_s26] sm:$0xff] %v2075_v37 }
 0x4e4 PF: > { %s22_s17 = sadd.s32 1, %s2368_s17  }
 0x4e5   : > { %p19_p3 = scmp.ge.s32.totalorder %s22_s17, 4  }
 0x4e7   :  { %21 = sbr.rel (!%p19_p3) target bundleno = 1 (0x1), region = 99 }
 0x4ee   :  { %2097 = vsyncpa [#allocation3], 1 }
 0x4ef   :  { %2099 = vsyncpa [#allocation3 + $0x1], 1 }

// kernel: cnn_network_seq_forward.5
= control target key start
LH: loop header
LB: loop body
LE: loop exit
PB: predicated region body
PF: predicated region fallthrough
CT: control target
= control target key end

     0   :  { %v392_v36 = vmov 0.0   ;;  %v393_v37 = vmov 1983009808   ;;  %v273_v39 = vlaneseq  ;;  %s519_s1 = inlined_call_operand.vmem [shape: bf16[256,256], index: 1, kind: input, shape index: {}]   ;;  %s520_s0 = inlined_call_operand.vmem [shape: f32[2,256], index: 0, kind: input, shape index: {}]   ;;  %s521_s2 = inlined_call_operand.vmem [shape: f32[1,256], index: 2, kind: input, shape index: {}]   ;;  %s522_s3 = inlined_call_operand.vmem [shape: f32[2,256], index: 3, kind: output, shape index: {}]  }
   0x1   :  { %v344_v0 = vld [vmem:[%s519_s1 + $0x4] ss:$8 sps:$4 sm:$0xff]   ;;  %v346_v1 = vld [vmem:[%s519_s1] ss:$8 sps:$4 sm:$0xff]   ;;  %v347_v2 = vld [vmem:[%s519_s1 + $0x14] ss:$8 sps:$4 sm:$0xff]   ;;  %v271_v38 = vunpack.c.l.s4 %v393_v37 }
   0x2   :  { %226 = vmatprep.subr.bf16.mxu0 %v344_v0  ;;  %v349_v3 = vld [vmem:[%s519_s1 + $0x10] ss:$8 sps:$4 sm:$0xff]   ;;  %v350_v4 = vld [vmem:[%s519_s1 + $0x24] ss:$8 sps:$4 sm:$0xff]   ;;  %v352_v5 = vld [vmem:[%s519_s1 + $0x20] ss:$8 sps:$4 sm:$0xff]  }
   0x3   :  { %227 = vmatpush1.bf16.msra.mxu0 %v346_v1  ;;  %v353_v6 = vld [vmem:[%s519_s1 + $0x34] ss:$8 sps:$4 sm:$0xff]   ;;  %v355_v7 = vld [vmem:[%s519_s1 + $0x30] ss:$8 sps:$4 sm:$0xff]   ;;  %v356_v8 = vld [vmem:[%s519_s1 + $0x44] ss:$8 sps:$4 sm:$0xff]   ;;  %v272_v40 = vunpack.c.0.s8 %v271_v38 }
   0x4   :  { %228 = vmatprep.subr.bf16.mxu0 %v347_v2  ;;  %v358_v9 = vld [vmem:[%s519_s1 + $0x40] ss:$8 sps:$4 sm:$0xff]   ;;  %v359_v10 = vld [vmem:[%s519_s1 + $0x54] ss:$8 sps:$4 sm:$0xff]   ;;  %v361_v11 = vld [vmem:[%s519_s1 + $0x50] ss:$8 sps:$4 sm:$0xff]  }
   0x5   :  { %v362_v12 = vld [vmem:[%s519_s1 + $0x64] ss:$8 sps:$4 sm:$0xff]   ;;  %v309_v13 = vld.sshfl [vmem:[%s520_s0] sm:$0x33 pattern:$0x76325410] }
   0x6   :  { %v29_v14 = vcombine.high %v309_v13, %v309_v13  ;;  %v364_v15 = vld [vmem:[%s519_s1 + $0x60] ss:$8 sps:$4 sm:$0xff]   ;;  %v365_v16 = vld [vmem:[%s519_s1 + $0x74] ss:$8 sps:$4 sm:$0xff]   ;;  %v367_v18 = vld [vmem:[%s519_s1 + $0x70] ss:$8 sps:$4 sm:$0xff]   ;;  %v32_v35 = vpack.c.bf16 %v309_v13, %v309_v13 }
   0x7   :  { %229 = vmatpush1.bf16.msra.mxu0 %v349_v3  ;;  %v368_v19 = vld [vmem:[%s519_s1 + $0x84] ss:$8 sps:$4 sm:$0xff]   ;;  %v370_v20 = vld [vmem:[%s519_s1 + $0x80] ss:$8 sps:$4 sm:$0xff]   ;;  %v371_v21 = vld [vmem:[%s519_s1 + $0x94] ss:$8 sps:$4 sm:$0xff]  }
   0x8   :  { %230 = vmatprep.subr.bf16.mxu0 %v350_v4  ;;  %v33_v17 = vpack.c.bf16 %v29_v14, %v29_v14  ;;  %v373_v22 = vld [vmem:[%s519_s1 + $0x90] ss:$8 sps:$4 sm:$0xff]   ;;  %v374_v23 = vld [vmem:[%s519_s1 + $0xa4] ss:$8 sps:$4 sm:$0xff]   ;;  %v376_v24 = vld [vmem:[%s519_s1 + $0xa0] ss:$8 sps:$4 sm:$0xff]  }
   0x9   :  { %v377_v25 = vld [vmem:[%s519_s1 + $0xb4] ss:$8 sps:$4 sm:$0xff]   ;;  %v379_v26 = vld [vmem:[%s519_s1 + $0xb0] ss:$8 sps:$4 sm:$0xff]   ;;  %v380_v27 = vld [vmem:[%s519_s1 + $0xc4] ss:$8 sps:$4 sm:$0xff]  }
   0xa   :  { %258 = vmatprep.mubr.bf16.mxu0 %v33_v17  ;;  %v382_v28 = vld [vmem:[%s519_s1 + $0xc0] ss:$8 sps:$4 sm:$0xff]   ;;  %v383_v29 = vld [vmem:[%s519_s1 + $0xd4] ss:$8 sps:$4 sm:$0xff]   ;;  %v385_v30 = vld [vmem:[%s519_s1 + $0xd0] ss:$8 sps:$4 sm:$0xff]  }
   0xb   :  { %231 = vmatpush1.bf16.msra.mxu0 %v352_v5  ;;  %v386_v31 = vld [vmem:[%s519_s1 + $0xe4] ss:$8 sps:$4 sm:$0xff]   ;;  %v388_v32 = vld [vmem:[%s519_s1 + $0xe0] ss:$8 sps:$4 sm:$0xff]   ;;  %v389_v33 = vld [vmem:[%s519_s1 + $0xf4] ss:$8 sps:$4 sm:$0xff]  }
   0xc   :  { %232 = vmatprep.subr.bf16.mxu0 %v353_v6  ;;  %v391_v34 = vld [vmem:[%s519_s1 + $0xf0] ss:$8 sps:$4 sm:$0xff]   ;;  %18 = vst [vmem:[#allocation2] sm:$0xf] %v392_v36  ;;  %v274_v41 = vshrl.u32 %v273_v39, 7 }
   0xd   :  { %v284_v47 = vld [vmem:[%s521_s2] sm:$0x3] }
   0xe   :  { %v275_v43 = vsub.s32 %v272_v40, %v274_v41  ;;  %v288_v44 = vsub.s32 0, %v274_v41  ;;  %v292_v45 = vsub.s32 1, %v274_v41 }
   0xf   :  { %233 = vmatpush1.bf16.msra.mxu0 %v355_v7 }
  0x10   :  { %234 = vmatprep.subr.bf16.mxu0 %v356_v8  ;;  %v289_v53 = vrot.slane %v284_v47, %v288_v44  ;;  %v293_v54 = vrot.slane %v284_v47, %v292_v45 }
  0x12   :  { %v294_v56 = vcombine.low %v289_v53, %v293_v54 }
  0x13   :  { %235 = vmatpush1.bf16.msra.mxu0 %v358_v9  ;;  %v19_v50 = vld [vmem:[#allocation2] sm:$0xf] }
  0x14   :  { %236 = vmatprep.subr.bf16.mxu0 %v359_v10  ;;  %v301_v57 = vrot.slane %v294_v56, %v275_v43 }
  0x17   :  { %237 = vmatpush1.bf16.msra.mxu0 %v361_v11 }
  0x18   :  { %238 = vmatprep.subr.bf16.mxu0 %v362_v12 }
  0x1b   :  { %239 = vmatpush1.bf16.msra.mxu0 %v364_v15 }
  0x1c   :  { %240 = vmatprep.subr.bf16.mxu0 %v365_v16 }
  0x1f   :  { %241 = vmatpush1.bf16.msra.mxu0 %v367_v18 }
  0x20   :  { %242 = vmatprep.subr.bf16.mxu0 %v368_v19 }
  0x23   :  { %243 = vmatpush1.bf16.msra.mxu0 %v370_v20 }
  0x24   :  { %244 = vmatprep.subr.bf16.mxu0 %v371_v21 }
  0x27   :  { %245 = vmatpush1.bf16.msra.mxu0 %v373_v22 }
  0x28   :  { %246 = vmatprep.subr.bf16.mxu0 %v374_v23 }
  0x2b   :  { %247 = vmatpush1.bf16.msra.mxu0 %v376_v24 }
  0x2c   :  { %248 = vmatprep.subr.bf16.mxu0 %v377_v25 }
  0x2f   :  { %249 = vmatpush1.bf16.msra.mxu0 %v379_v26 }
  0x30   :  { %250 = vmatprep.subr.bf16.mxu0 %v380_v27 }
  0x33   :  { %251 = vmatpush1.bf16.msra.mxu0 %v382_v28 }
  0x34   :  { %252 = vmatprep.subr.bf16.mxu0 %v383_v29 }
  0x37   :  { %253 = vmatpush1.bf16.msra.mxu0 %v385_v30 }
  0x38   :  { %254 = vmatprep.subr.bf16.mxu0 %v386_v31 }
  0x3b   :  { %255 = vmatpush1.bf16.msra.mxu0 %v388_v32 }
  0x3c   :  { %256 = vmatprep.subr.bf16.mxu0 %v389_v33 }
  0x3f   :  { %257 = vmatpush1.bf16.msra.mxu0 %v391_v34 }
  0x42   :  { %259 = vmatmul.mubr.bf16.vlgmr.msra.gmra.mrb[0].mxu0 %v32_v35 }
 0x115   :  { %v260_v42 = vpop.f32.mrb[0].mxu0 }
 0x116   :  { %v262_v46 = vpop.f32.mrb[1].mxu0 }
 0x117   :  { %v269_v48 = vcombine.low %v260_v42, %v262_v46  ;;  %v264_v49 = vpop.f32.mrb[2].mxu0 }
 0x118   :  { %v265_v51 = vpop.f32.mrb[3].mxu0 }
 0x119   :  { %v276_v52 = vrot.slane %v269_v48, %v275_v43 }
 0x11b   :  { %v278_v55 = vadd.f32 %v276_v52, %v19_v50 }
 0x11d   :  { %279 = vst [vmem:[#allocation2] sm:$0xf] %v278_v55 }
 0x124   :  { %v283_v58 = vld [vmem:[#allocation2] sm:$0xf] }
 0x125   :  { %v303_v59 = vadd.f32 %v301_v57, %v283_v58 }
 0x127   :  { %304 = vst [vmem:[%s522_s3] sm:$0xf] %v303_v59 }

</bundles_post_ra>
